<compile_context>
chip_gen: v7x
topology: tpu7x:2x2x1
jax: 0.10.0
libtpu: 0.0.40
codegen_flags: <defaults>
</compile_context>

<pallas_src>
import functools
import math

import jax
import jax.numpy as jnp
from jax.experimental import pallas as pl
from jax.experimental.pallas import tpu as pltpu

# Model hyper-parameters (small, consistent with the module's shapes).
D_MODEL = 32
NHEAD = 4
DIM_FF = 64
NUM_LAYERS = 2
SEQ = 8
BATCH = 2
LN_EPS = 1e-5
_BIAS_W = 128          # lane-tile-aligned width of the packed bias/LN slab


def _layernorm(x, w, b, eps=LN_EPS):
    # E[x^2] - E[x]^2 form: the two cross-lane reductions issue independently.
    m = jnp.mean(x, axis=-1, keepdims=True)
    m2 = jnp.mean(x * x, axis=-1, keepdims=True)
    var = m2 - m * m
    inv = jax.lax.rsqrt(var + eps)
    return (x - m) * inv * w + b


def fused_encoder_kernel(x_ref, wqkvo_ref, wff1_ref, wff2_ref, vb_ref, *rest,
                         num_layers, nhead, apply_final_norm):
    """One grid program = full encoder for one batch element.

    x_ref    : (S*B, E)      tokens, row-major (s, b) order (free view of (S,B,E))
    wqkvo_ref: (L, 4, E, E)  [q.T*scale | k.T | v.T | out.T]    (pre-transposed)
    wff1_ref : (L, E, F)     linear1.T
    wff2_ref : (L, F, E)     linear2.T
    vb_ref   : (L, 10, 128)  [q_b*scale,k_b,v_b,out_b,ln1w,ln1b,ln2w,ln2b,l1_b,l2_b]
    fn_ref   : (2, E)        final-norm rows (only present if apply_final_norm)
    o_ref    : (1, S, E)     this batch's output block
    """
    if apply_final_norm:
        fn_ref, o_ref = rest
    else:
        (o_ref,) = rest

    _, S, E = o_ref.shape
    H = nhead
    Dh = E // H
    F = wff1_ref.shape[-1]
    B = x_ref.shape[0] // S

    b = pl.program_id(0)
    # Fold the (S,B,E) -> per-batch (S,E) boundary transpose into a strided
    # sublane read: batch b occupies rows b, b+B, b+2B, ... of the (S*B, E) slab.
    x = x_ref[pl.ds(b, S, stride=B), :]                       # (S, E) f32

    for l in range(num_layers):                               # static unroll
        wq = wqkvo_ref[l, 0]                                  # (E, E), scale folded
        wk = wqkvo_ref[l, 1]
        wv = wqkvo_ref[l, 2]
        wo = wqkvo_ref[l, 3]
        w1 = wff1_ref[l]                                      # (E, F)
        w2 = wff2_ref[l]                                      # (F, E)

        vb = vb_ref[l]                                        # (10, 128)
        bq = vb[0:1, :E]
        bk = vb[1:2, :E]
        bv = vb[2:3, :E]
        bo = vb[3:4, :E]
        ln1w = vb[4:5, :E]
        ln1b = vb[5:6, :E]
        ln2w = vb[6:7, :E]
        ln2b = vb[7:8, :E]
        b1 = vb[8:9, :F]
        b2 = vb[9:10, :E]

        # ----- self-attention -------------------------------------------------
        q = jnp.dot(x, wq, preferred_element_type=jnp.float32) + bq   # (S, E)
        k = jnp.dot(x, wk, preferred_element_type=jnp.float32) + bk
        v = jnp.dot(x, wv, preferred_element_type=jnp.float32) + bv

        def heads(t):
            # (S, E) -> (H, S, Dh): single reshape + major-dim transpose.
            return jnp.transpose(t.reshape(S, H, Dh), (1, 0, 2))

        qh, kh, vh = heads(q), heads(k), heads(v)             # (H, S, Dh)

        s = jnp.einsum('hqd,hkd->hqk', qh, kh,
                       preferred_element_type=jnp.float32)    # (H, S, S)
        s = s - jnp.max(s, axis=-1, keepdims=True)
        p = jnp.exp(s)
        denom = jnp.sum(p, axis=-1, keepdims=True)            # (H, S, 1)
        o = jnp.einsum('hqk,hkd->hqd', p, vh,
                       preferred_element_type=jnp.float32)    # (H, S, Dh)
        o = o / denom                                         # deferred, exact divide

        attn = jnp.transpose(o, (1, 0, 2)).reshape(S, E)      # merge heads
        attn = jnp.dot(attn, wo, preferred_element_type=jnp.float32) + bo

        # ----- add & norm 1 (post-norm) ---------------------------------------
        y = _layernorm(x + attn, ln1w, ln1b)

        # ----- feed-forward: linear1 -> ReLU -> linear2 -----------------------
        h1 = jnp.dot(y, w1, preferred_element_type=jnp.float32) + b1
        h1 = jnp.maximum(h1, 0.0)
        ff = jnp.dot(h1, w2, preferred_element_type=jnp.float32) + b2

        # ----- add & norm 2 ----------------------------------------------------
        x = _layernorm(y + ff, ln2w, ln2b)

    if apply_final_norm:
        x = _layernorm(x, fn_ref[0:1, :], fn_ref[1:2, :])

    o_ref[0] = x


# ------------------------------- wrapper -----------------------------------
def _pack_params(layers_params, E, F, H):
    """Trace-time packing (constant-folded by XLA; nothing inside the kernel)."""
    Dh = E // H
    scale = 1.0 / math.sqrt(Dh)
    wqkvo, wff1, wff2, vbl = [], [], [], []
    for lp in layers_params:
        (in_w, in_b, out_w, out_b, ln1_w, ln1_b, ln2_w, ln2_b,
         l1_w, l1_b, l2_w, l2_b) = lp
        q_w, k_w, v_w = in_w[:E], in_w[E:2 * E], in_w[2 * E:]
        q_b, k_b, v_b = in_b[..., :E], in_b[..., E:2 * E], in_b[..., 2 * E:]
        # Pre-transpose so the kernel does x @ w; fold 1/sqrt(Dh) into Q.
        wqkvo.append(jnp.stack([q_w.T * scale, k_w.T, v_w.T, out_w.T], axis=0))
        wff1.append(l1_w.T)                                   # (E, F)
        wff2.append(l2_w.T)                                   # (F, E)
        rows = [q_b * scale, k_b, v_b, out_b,
                ln1_w, ln1_b, ln2_w, ln2_b, l1_b, l2_b]
        padded = [jnp.pad(r.reshape(1, -1).astype(jnp.float32),
                          ((0, 0), (0, _BIAS_W - r.size))) for r in rows]
        vbl.append(jnp.concatenate(padded, axis=0))           # (10, 128)
    return (jnp.stack(wqkvo, 0).astype(jnp.float32),          # (L, 4, E, E)
            jnp.stack(wff1, 0).astype(jnp.float32),           # (L, E, F)
            jnp.stack(wff2, 0).astype(jnp.float32),           # (L, F, E)
            jnp.stack(vbl, 0))                                # (L, 10, 128)


def transformer_encoder(src, layers_params, norm_params=None):
    """src: (S, B, E) like PyTorch batch_first=False. Returns (S, B, E)."""
    S, B, E = src.shape
    F = layers_params[0][8].shape[0]          # l1_w: (F, E)
    L = len(layers_params)
    H = NHEAD

    WQKVO, WFF1, WFF2, VB = _pack_params(layers_params, E, F, H)
    apply_final_norm = norm_params is not None

    # Free row-major view: (S, B, E) -> (S*B, E); the kernel undoes it with a
    # strided sublane read, so no boundary transpose dispatch on the input side.
    args = [src.reshape(S * B, E), WQKVO, WFF1, WFF2, VB]
    in_specs = [
        pl.BlockSpec((S * B, E), lambda b: (0, 0)),
        pl.BlockSpec((L, 4, E, E), lambda b: (0, 0, 0, 0)),
        pl.BlockSpec((L, E, F), lambda b: (0, 0, 0)),
        pl.BlockSpec((L, F, E), lambda b: (0, 0, 0)),
        pl.BlockSpec((L, 10, _BIAS_W), lambda b: (0, 0, 0)),
    ]
    if apply_final_norm:
        FN = jnp.concatenate([norm_params[0].reshape(1, -1),
                              norm_params[1].reshape(1, -1)],
                             axis=0).astype(jnp.float32)      # (2, E)
        args.append(FN)
        in_specs.append(pl.BlockSpec((2, E), lambda b: (0, 0)))

    kern = functools.partial(fused_encoder_kernel,
                             num_layers=L, nhead=H,
                             apply_final_norm=apply_final_norm)

    # Grid over batch (parallel -> shards across TensorCores on v7x); each
    # program owns a disjoint (1, S, E) output block (race-free).  All layer
    # weights are full-block, constant-index inputs -> DMA'd once, resident.
    out = pl.pallas_call(
        kern,
        grid=(B,),
        in_specs=in_specs,
        out_specs=pl.BlockSpec((1, S, E), lambda b: (b, 0, 0)),
        out_shape=jax.ShapeDtypeStruct((B, S, E), src.dtype),
        compiler_params=pltpu.CompilerParams(
            dimension_semantics=("parallel",)),
    )(*args)
    return jnp.transpose(out, (1, 0, 2))                      # -> (S, B, E)


# ----------------------------- reference (pure JAX) -----------------------------
def _ref_layernorm(x, w, b, eps=LN_EPS):
    mu = jnp.mean(x, axis=-1, keepdims=True)
    xc = x - mu
    var = jnp.mean(xc * xc, axis=-1, keepdims=True)
    return xc * jax.lax.rsqrt(var + eps) * w + b


def _ref_layer(x, lp):
    (in_w, in_b, out_w, out_b, ln1_w, ln1_b, ln2_w, ln2_b,
     l1_w, l1_b, l2_w, l2_b) = lp
    E, H = D_MODEL, NHEAD
    Dh = E // H
    qkv = x @ in_w.T + in_b[0]
    q, k, v = qkv[..., :E], qkv[..., E:2 * E], qkv[..., 2 * E:]

    def split(t):  # (B,S,E) -> (B,H,S,Dh)
        B, S, _ = t.shape
        return jnp.transpose(t.reshape(B, S, H, Dh), (0, 2, 1, 3))

    qh, kh, vh = split(q), split(k), split(v)
    s = jnp.einsum("bhqd,bhkd->bhqk", qh, kh) / (Dh ** 0.5)
    p = jax.nn.softmax(s, axis=-1)
    o = jnp.einsum("bhqk,bhkd->bhqd", p, vh)
    B, S = x.shape[0], x.shape[1]
    o = jnp.transpose(o, (0, 2, 1, 3)).reshape(B, S, E)
    attn = o @ out_w.T + out_b[0]
    y = _ref_layernorm(x + attn, ln1_w[0], ln1_b[0])
    ff = jnp.maximum(y @ l1_w.T + l1_b[0], 0.0) @ l2_w.T + l2_b[0]
    return _ref_layernorm(y + ff, ln2_w[0], ln2_b[0])


def _ref_encoder(src, layers_params, norm_params):
    x = jnp.transpose(src, (1, 0, 2))
    for lp in layers_params:
        x = _ref_layer(x, lp)
    if norm_params is not None:
        x = _ref_layernorm(x, norm_params[0][0], norm_params[1][0])
    return jnp.transpose(x, (1, 0, 2))


# ----------------------------- parameter construction ---------------------------
def make_layer_params(key):
    ks = jax.random.split(key, 6)
    E, F = D_MODEL, DIM_FF
    in_w = jax.random.normal(ks[0], (3 * E, E), jnp.float32) * 0.08
    in_b = jax.random.normal(ks[1], (1, 3 * E), jnp.float32) * 0.02
    out_w = jax.random.normal(ks[2], (E, E), jnp.float32) * 0.08
    out_b = jnp.zeros((1, E), jnp.float32)
    ln1_w = jnp.ones((1, E), jnp.float32)
    ln1_b = jnp.zeros((1, E), jnp.float32)
    ln2_w = jnp.ones((1, E), jnp.float32)
    ln2_b = jnp.zeros((1, E), jnp.float32)
    l1_w = jax.random.normal(ks[3], (F, E), jnp.float32) * 0.08
    l1_b = jax.random.normal(ks[4], (1, F), jnp.float32) * 0.02
    l2_w = jax.random.normal(ks[5], (E, F), jnp.float32) * 0.08
    l2_b = jnp.zeros((1, E), jnp.float32)
    return (in_w, in_b, out_w, out_b, ln1_w, ln1_b, ln2_w, ln2_b,
            l1_w, l1_b, l2_w, l2_b)


if __name__ == "__main__":
    root = jax.random.PRNGKey(0)
    k_src, *k_layers = jax.random.split(root, NUM_LAYERS + 1)

    layers_params = [make_layer_params(k) for k in k_layers]
    norm_params = (jnp.ones((1, D_MODEL), jnp.float32),
                   jnp.zeros((1, D_MODEL), jnp.float32))

    src = jax.random.normal(k_src, (SEQ, BATCH, D_MODEL), jnp.float32)

    out = transformer_encoder(src, layers_params, norm_params)
    out = jax.block_until_ready(out)

    ref = _ref_encoder(src, layers_params, norm_params)
    assert out.shape == (SEQ, BATCH, D_MODEL)
    # Exact softmax divide + f32 everywhere -> tight tolerance.
    assert jnp.allclose(out, ref, rtol=1e-3, atol=1e-3), "mismatch vs JAX reference"

    print("KERNEL_OK")
</pallas_src>

<mosaic_0001>
module attributes {stable_mosaic.version = 11 : i64} {
  func.func @fused_encoder_kernel(%arg0: i32, %arg1: memref<16x32xf32, #tpu.memory_space<vmem>>, %arg2: memref<2x4x32x32xf32, #tpu.memory_space<vmem>>, %arg3: memref<2x32x64xf32, #tpu.memory_space<vmem>>, %arg4: memref<2x64x32xf32, #tpu.memory_space<vmem>>, %arg5: memref<2x10x128xf32, #tpu.memory_space<vmem>>, %arg6: memref<2x32xf32, #tpu.memory_space<vmem>>, %arg7: memref<1x8x32xf32, #tpu.memory_space<vmem>>) attributes {dimension_semantics = [#tpu.dimension_semantics<parallel>], iteration_bounds = array<i64: 2>, scalar_prefetch = 0 : i64, scratch_operands = 0 : i64, tpu.core_type = #tpu.core_type<tc>, window_params = [{pipeline_mode = #tpu.pipeline_mode<synchronous>, transform_indices = @transform_0, window_bounds = array<i64: 16, 32>}, {pipeline_mode = #tpu.pipeline_mode<synchronous>, transform_indices = @transform_1, window_bounds = array<i64: 2, 4, 32, 32>}, {pipeline_mode = #tpu.pipeline_mode<synchronous>, transform_indices = @transform_2, window_bounds = array<i64: 2, 32, 64>}, {pipeline_mode = #tpu.pipeline_mode<synchronous>, transform_indices = @transform_3, window_bounds = array<i64: 2, 64, 32>}, {pipeline_mode = #tpu.pipeline_mode<synchronous>, transform_indices = @transform_4, window_bounds = array<i64: 2, 10, 128>}, {pipeline_mode = #tpu.pipeline_mode<synchronous>, transform_indices = @transform_5, window_bounds = array<i64: 2, 32>}, {transform_indices = @transform_6, window_bounds = array<i64: 1, 8, 32>}]} {
    %0 = arith.index_cast %arg0 : i32 to index
    %c0 = arith.constant 0 : index
    %1 = tpu.strided_load %arg1[%0, %c0] {strides = array<i32: 2, 1>} : memref<16x32xf32, #tpu.memory_space<vmem>>, vector<8x32xf32>
    %c0_0 = arith.constant 0 : index
    %c0_1 = arith.constant 0 : index
    %c0_2 = arith.constant 0 : index
    %c0_3 = arith.constant 0 : index
    %2 = vector.load %arg2[%c0_0, %c0_1, %c0_2, %c0_3] : memref<2x4x32x32xf32, #tpu.memory_space<vmem>>, vector<1x1x32x32xf32>
    %3 = vector.shape_cast %2 : vector<1x1x32x32xf32> to vector<32x32xf32>
    %c0_4 = arith.constant 0 : index
    %c1 = arith.constant 1 : index
    %c0_5 = arith.constant 0 : index
    %c0_6 = arith.constant 0 : index
    %4 = vector.load %arg2[%c0_4, %c1, %c0_5, %c0_6] : memref<2x4x32x32xf32, #tpu.memory_space<vmem>>, vector<1x1x32x32xf32>
    %5 = vector.shape_cast %4 : vector<1x1x32x32xf32> to vector<32x32xf32>
    %c0_7 = arith.constant 0 : index
    %c2 = arith.constant 2 : index
    %c0_8 = arith.constant 0 : index
    %c0_9 = arith.constant 0 : index
    %6 = vector.load %arg2[%c0_7, %c2, %c0_8, %c0_9] : memref<2x4x32x32xf32, #tpu.memory_space<vmem>>, vector<1x1x32x32xf32>
    %7 = vector.shape_cast %6 : vector<1x1x32x32xf32> to vector<32x32xf32>
    %c0_10 = arith.constant 0 : index
    %c3 = arith.constant 3 : index
    %c0_11 = arith.constant 0 : index
    %c0_12 = arith.constant 0 : index
    %8 = vector.load %arg2[%c0_10, %c3, %c0_11, %c0_12] : memref<2x4x32x32xf32, #tpu.memory_space<vmem>>, vector<1x1x32x32xf32>
    %9 = vector.shape_cast %8 : vector<1x1x32x32xf32> to vector<32x32xf32>
    %c0_13 = arith.constant 0 : index
    %c0_14 = arith.constant 0 : index
    %c0_15 = arith.constant 0 : index
    %10 = vector.load %arg3[%c0_13, %c0_14, %c0_15] : memref<2x32x64xf32, #tpu.memory_space<vmem>>, vector<1x32x64xf32>
    %11 = vector.shape_cast %10 : vector<1x32x64xf32> to vector<32x64xf32>
    %c0_16 = arith.constant 0 : index
    %c0_17 = arith.constant 0 : index
    %c0_18 = arith.constant 0 : index
    %12 = vector.load %arg4[%c0_16, %c0_17, %c0_18] : memref<2x64x32xf32, #tpu.memory_space<vmem>>, vector<1x64x32xf32>
    %13 = vector.shape_cast %12 : vector<1x64x32xf32> to vector<64x32xf32>
    %c0_19 = arith.constant 0 : index
    %c0_20 = arith.constant 0 : index
    %c0_21 = arith.constant 0 : index
    %14 = vector.load %arg5[%c0_19, %c0_20, %c0_21] : memref<2x10x128xf32, #tpu.memory_space<vmem>>, vector<1x10x128xf32>
    %15 = vector.shape_cast %14 : vector<1x10x128xf32> to vector<10x128xf32>
    %16 = vector.extract_strided_slice %15 {offsets = [0, 0], sizes = [1, 32], strides = [1, 1]} : vector<10x128xf32> to vector<1x32xf32>
    %17 = vector.extract_strided_slice %15 {offsets = [1, 0], sizes = [1, 32], strides = [1, 1]} : vector<10x128xf32> to vector<1x32xf32>
    %18 = vector.extract_strided_slice %15 {offsets = [2, 0], sizes = [1, 32], strides = [1, 1]} : vector<10x128xf32> to vector<1x32xf32>
    %19 = vector.extract_strided_slice %15 {offsets = [3, 0], sizes = [1, 32], strides = [1, 1]} : vector<10x128xf32> to vector<1x32xf32>
    %20 = vector.extract_strided_slice %15 {offsets = [4, 0], sizes = [1, 32], strides = [1, 1]} : vector<10x128xf32> to vector<1x32xf32>
    %21 = vector.extract_strided_slice %15 {offsets = [5, 0], sizes = [1, 32], strides = [1, 1]} : vector<10x128xf32> to vector<1x32xf32>
    %22 = vector.extract_strided_slice %15 {offsets = [6, 0], sizes = [1, 32], strides = [1, 1]} : vector<10x128xf32> to vector<1x32xf32>
    %23 = vector.extract_strided_slice %15 {offsets = [7, 0], sizes = [1, 32], strides = [1, 1]} : vector<10x128xf32> to vector<1x32xf32>
    %24 = vector.extract_strided_slice %15 {offsets = [8, 0], sizes = [1, 64], strides = [1, 1]} : vector<10x128xf32> to vector<1x64xf32>
    %25 = vector.extract_strided_slice %15 {offsets = [9, 0], sizes = [1, 32], strides = [1, 1]} : vector<10x128xf32> to vector<1x32xf32>
    %cst = arith.constant dense<0.000000e+00> : vector<8x32xf32>
    %26 = tpu.matmul %1, %3, %cst {dimension_numbers = #tpu.dot_dimension_numbers<[1], [0], [0], [1], [0, 0, 1, 1], [], []>} : vector<8x32xf32>, vector<32x32xf32>, vector<8x32xf32> -> vector<8x32xf32>
    %27 = vector.broadcast %16 : vector<1x32xf32> to vector<8x32xf32>
    %28 = arith.addf %26, %27 : vector<8x32xf32>
    %cst_22 = arith.constant dense<0.000000e+00> : vector<8x32xf32>
    %29 = tpu.matmul %1, %5, %cst_22 {dimension_numbers = #tpu.dot_dimension_numbers<[1], [0], [0], [1], [0, 0, 1, 1], [], []>} : vector<8x32xf32>, vector<32x32xf32>, vector<8x32xf32> -> vector<8x32xf32>
    %30 = vector.broadcast %17 : vector<1x32xf32> to vector<8x32xf32>
    %31 = arith.addf %29, %30 : vector<8x32xf32>
    %cst_23 = arith.constant dense<0.000000e+00> : vector<8x32xf32>
    %32 = tpu.matmul %1, %7, %cst_23 {dimension_numbers = #tpu.dot_dimension_numbers<[1], [0], [0], [1], [0, 0, 1, 1], [], []>} : vector<8x32xf32>, vector<32x32xf32>, vector<8x32xf32> -> vector<8x32xf32>
    %33 = vector.broadcast %18 : vector<1x32xf32> to vector<8x32xf32>
    %34 = arith.addf %32, %33 : vector<8x32xf32>
    %35 = vector.shape_cast %28 : vector<8x32xf32> to vector<8x4x8xf32>
    %36 = tpu.transpose %35, [1, 0, 2] : vector<8x4x8xf32> -> vector<4x8x8xf32>
    %37 = vector.shape_cast %31 : vector<8x32xf32> to vector<8x4x8xf32>
    %38 = tpu.transpose %37, [1, 0, 2] : vector<8x4x8xf32> -> vector<4x8x8xf32>
    %39 = vector.shape_cast %34 : vector<8x32xf32> to vector<8x4x8xf32>
    %40 = tpu.transpose %39, [1, 0, 2] : vector<8x4x8xf32> -> vector<4x8x8xf32>
    "tpu.trace_start"() <{level = 10 : i32, message = "hqd,hkd->hqk"}> : () -> ()
    %cst_24 = arith.constant dense<0.000000e+00> : vector<4x8x8xf32>
    %41 = tpu.matmul %36, %38, %cst_24 {dimension_numbers = #tpu.dot_dimension_numbers<[2], [2], [1], [1], [0, 0, 0, 1, 1, 1], [0], [0]>} : vector<4x8x8xf32>, vector<4x8x8xf32>, vector<4x8x8xf32> -> vector<4x8x8xf32>
    "tpu.trace_stop"() : () -> ()
    %cst_25 = arith.constant dense<0xFF800000> : vector<4x8xf32>
    %42 = vector.multi_reduction <maximumf>, %41, %cst_25 [2] : vector<4x8x8xf32> to vector<4x8xf32>
    %43 = vector.shape_cast %42 : vector<4x8xf32> to vector<4x8x1xf32>
    %44 = vector.broadcast %43 : vector<4x8x1xf32> to vector<4x8x8xf32>
    %45 = arith.subf %41, %44 : vector<4x8x8xf32>
    %46 = math.exp %45 : vector<4x8x8xf32>
    %cst_26 = arith.constant dense<0.000000e+00> : vector<4x8xf32>
    %47 = vector.multi_reduction <add>, %46, %cst_26 [2] : vector<4x8x8xf32> to vector<4x8xf32>
    %48 = vector.shape_cast %47 : vector<4x8xf32> to vector<4x8x1xf32>
    "tpu.trace_start"() <{level = 10 : i32, message = "hqk,hkd->hqd"}> : () -> ()
    %cst_27 = arith.constant dense<0.000000e+00> : vector<4x8x8xf32>
    %49 = tpu.matmul %46, %40, %cst_27 {dimension_numbers = #tpu.dot_dimension_numbers<[2], [1], [1], [2], [0, 0, 0, 1, 1, 2], [0], [0]>} : vector<4x8x8xf32>, vector<4x8x8xf32>, vector<4x8x8xf32> -> vector<4x8x8xf32>
    "tpu.trace_stop"() : () -> ()
    %50 = vector.broadcast %48 : vector<4x8x1xf32> to vector<4x8x8xf32>
    %51 = arith.divf %49, %50 : vector<4x8x8xf32>
    %52 = tpu.transpose %51, [1, 0, 2] : vector<4x8x8xf32> -> vector<8x4x8xf32>
    %53 = vector.shape_cast %52 : vector<8x4x8xf32> to vector<8x32xf32>
    %cst_28 = arith.constant dense<0.000000e+00> : vector<8x32xf32>
    %54 = tpu.matmul %53, %9, %cst_28 {dimension_numbers = #tpu.dot_dimension_numbers<[1], [0], [0], [1], [0, 0, 1, 1], [], []>} : vector<8x32xf32>, vector<32x32xf32>, vector<8x32xf32> -> vector<8x32xf32>
    %55 = vector.broadcast %19 : vector<1x32xf32> to vector<8x32xf32>
    %56 = arith.addf %54, %55 : vector<8x32xf32>
    %57 = arith.addf %1, %56 : vector<8x32xf32>
    %cst_29 = arith.constant dense<0.000000e+00> : vector<8xf32>
    %58 = vector.multi_reduction <add>, %57, %cst_29 [1] : vector<8x32xf32> to vector<8xf32>
    %59 = vector.shape_cast %58 : vector<8xf32> to vector<8x1xf32>
    %cst_30 = arith.constant 3.200000e+01 : f32
    %60 = vector.broadcast %cst_30 : f32 to vector<8x1xf32>
    %61 = arith.divf %59, %60 : vector<8x1xf32>
    %62 = arith.mulf %57, %57 : vector<8x32xf32>
    %cst_31 = arith.constant dense<0.000000e+00> : vector<8xf32>
    %63 = vector.multi_reduction <add>, %62, %cst_31 [1] : vector<8x32xf32> to vector<8xf32>
    %64 = vector.shape_cast %63 : vector<8xf32> to vector<8x1xf32>
    %cst_32 = arith.constant 3.200000e+01 : f32
    %65 = vector.broadcast %cst_32 : f32 to vector<8x1xf32>
    %66 = arith.divf %64, %65 : vector<8x1xf32>
    %67 = arith.mulf %61, %61 : vector<8x1xf32>
    %68 = arith.subf %66, %67 : vector<8x1xf32>
    %cst_33 = arith.constant 9.99999974E-6 : f32
    %69 = vector.broadcast %cst_33 : f32 to vector<8x1xf32>
    %70 = arith.addf %68, %69 : vector<8x1xf32>
    %71 = math.rsqrt %70 : vector<8x1xf32>
    %72 = vector.broadcast %61 : vector<8x1xf32> to vector<8x32xf32>
    %73 = arith.subf %57, %72 : vector<8x32xf32>
    %74 = vector.broadcast %71 : vector<8x1xf32> to vector<8x32xf32>
    %75 = arith.mulf %73, %74 : vector<8x32xf32>
    %76 = vector.broadcast %20 : vector<1x32xf32> to vector<8x32xf32>
    %77 = arith.mulf %75, %76 : vector<8x32xf32>
    %78 = vector.broadcast %21 : vector<1x32xf32> to vector<8x32xf32>
    %79 = arith.addf %77, %78 : vector<8x32xf32>
    %cst_34 = arith.constant dense<0.000000e+00> : vector<8x64xf32>
    %80 = tpu.matmul %79, %11, %cst_34 {dimension_numbers = #tpu.dot_dimension_numbers<[1], [0], [0], [1], [0, 0, 1, 1], [], []>} : vector<8x32xf32>, vector<32x64xf32>, vector<8x64xf32> -> vector<8x64xf32>
    %81 = vector.broadcast %24 : vector<1x64xf32> to vector<8x64xf32>
    %82 = arith.addf %80, %81 : vector<8x64xf32>
    %cst_35 = arith.constant 0.000000e+00 : f32
    %83 = vector.broadcast %cst_35 : f32 to vector<8x64xf32>
    %84 = arith.maximumf %82, %83 : vector<8x64xf32>
    %cst_36 = arith.constant dense<0.000000e+00> : vector<8x32xf32>
    %85 = tpu.matmul %84, %13, %cst_36 {dimension_numbers = #tpu.dot_dimension_numbers<[1], [0], [0], [1], [0, 0, 1, 1], [], []>} : vector<8x64xf32>, vector<64x32xf32>, vector<8x32xf32> -> vector<8x32xf32>
    %86 = vector.broadcast %25 : vector<1x32xf32> to vector<8x32xf32>
    %87 = arith.addf %85, %86 : vector<8x32xf32>
    %88 = arith.addf %79, %87 : vector<8x32xf32>
    %cst_37 = arith.constant dense<0.000000e+00> : vector<8xf32>
    %89 = vector.multi_reduction <add>, %88, %cst_37 [1] : vector<8x32xf32> to vector<8xf32>
    %90 = vector.shape_cast %89 : vector<8xf32> to vector<8x1xf32>
    %cst_38 = arith.constant 3.200000e+01 : f32
    %91 = vector.broadcast %cst_38 : f32 to vector<8x1xf32>
    %92 = arith.divf %90, %91 : vector<8x1xf32>
    %93 = arith.mulf %88, %88 : vector<8x32xf32>
    %cst_39 = arith.constant dense<0.000000e+00> : vector<8xf32>
    %94 = vector.multi_reduction <add>, %93, %cst_39 [1] : vector<8x32xf32> to vector<8xf32>
    %95 = vector.shape_cast %94 : vector<8xf32> to vector<8x1xf32>
    %cst_40 = arith.constant 3.200000e+01 : f32
    %96 = vector.broadcast %cst_40 : f32 to vector<8x1xf32>
    %97 = arith.divf %95, %96 : vector<8x1xf32>
    %98 = arith.mulf %92, %92 : vector<8x1xf32>
    %99 = arith.subf %97, %98 : vector<8x1xf32>
    %cst_41 = arith.constant 9.99999974E-6 : f32
    %100 = vector.broadcast %cst_41 : f32 to vector<8x1xf32>
    %101 = arith.addf %99, %100 : vector<8x1xf32>
    %102 = math.rsqrt %101 : vector<8x1xf32>
    %103 = vector.broadcast %92 : vector<8x1xf32> to vector<8x32xf32>
    %104 = arith.subf %88, %103 : vector<8x32xf32>
    %105 = vector.broadcast %102 : vector<8x1xf32> to vector<8x32xf32>
    %106 = arith.mulf %104, %105 : vector<8x32xf32>
    %107 = vector.broadcast %22 : vector<1x32xf32> to vector<8x32xf32>
    %108 = arith.mulf %106, %107 : vector<8x32xf32>
    %109 = vector.broadcast %23 : vector<1x32xf32> to vector<8x32xf32>
    %110 = arith.addf %108, %109 : vector<8x32xf32>
    %c1_42 = arith.constant 1 : index
    %c0_43 = arith.constant 0 : index
    %c0_44 = arith.constant 0 : index
    %c0_45 = arith.constant 0 : index
    %111 = vector.load %arg2[%c1_42, %c0_43, %c0_44, %c0_45] : memref<2x4x32x32xf32, #tpu.memory_space<vmem>>, vector<1x1x32x32xf32>
    %112 = vector.shape_cast %111 : vector<1x1x32x32xf32> to vector<32x32xf32>
    %c1_46 = arith.constant 1 : index
    %c1_47 = arith.constant 1 : index
    %c0_48 = arith.constant 0 : index
    %c0_49 = arith.constant 0 : index
    %113 = vector.load %arg2[%c1_46, %c1_47, %c0_48, %c0_49] : memref<2x4x32x32xf32, #tpu.memory_space<vmem>>, vector<1x1x32x32xf32>
    %114 = vector.shape_cast %113 : vector<1x1x32x32xf32> to vector<32x32xf32>
    %c1_50 = arith.constant 1 : index
    %c2_51 = arith.constant 2 : index
    %c0_52 = arith.constant 0 : index
    %c0_53 = arith.constant 0 : index
    %115 = vector.load %arg2[%c1_50, %c2_51, %c0_52, %c0_53] : memref<2x4x32x32xf32, #tpu.memory_space<vmem>>, vector<1x1x32x32xf32>
    %116 = vector.shape_cast %115 : vector<1x1x32x32xf32> to vector<32x32xf32>
    %c1_54 = arith.constant 1 : index
    %c3_55 = arith.constant 3 : index
    %c0_56 = arith.constant 0 : index
    %c0_57 = arith.constant 0 : index
    %117 = vector.load %arg2[%c1_54, %c3_55, %c0_56, %c0_57] : memref<2x4x32x32xf32, #tpu.memory_space<vmem>>, vector<1x1x32x32xf32>
    %118 = vector.shape_cast %117 : vector<1x1x32x32xf32> to vector<32x32xf32>
    %c1_58 = arith.constant 1 : index
    %c0_59 = arith.constant 0 : index
    %c0_60 = arith.constant 0 : index
    %119 = vector.load %arg3[%c1_58, %c0_59, %c0_60] : memref<2x32x64xf32, #tpu.memory_space<vmem>>, vector<1x32x64xf32>
    %120 = vector.shape_cast %119 : vector<1x32x64xf32> to vector<32x64xf32>
    %c1_61 = arith.constant 1 : index
    %c0_62 = arith.constant 0 : index
    %c0_63 = arith.constant 0 : index
    %121 = vector.load %arg4[%c1_61, %c0_62, %c0_63] : memref<2x64x32xf32, #tpu.memory_space<vmem>>, vector<1x64x32xf32>
    %122 = vector.shape_cast %121 : vector<1x64x32xf32> to vector<64x32xf32>
    %c1_64 = arith.constant 1 : index
    %c0_65 = arith.constant 0 : index
    %c0_66 = arith.constant 0 : index
    %123 = vector.load %arg5[%c1_64, %c0_65, %c0_66] : memref<2x10x128xf32, #tpu.memory_space<vmem>>, vector<1x10x128xf32>
    %124 = vector.shape_cast %123 : vector<1x10x128xf32> to vector<10x128xf32>
    %125 = vector.extract_strided_slice %124 {offsets = [0, 0], sizes = [1, 32], strides = [1, 1]} : vector<10x128xf32> to vector<1x32xf32>
    %126 = vector.extract_strided_slice %124 {offsets = [1, 0], sizes = [1, 32], strides = [1, 1]} : vector<10x128xf32> to vector<1x32xf32>
    %127 = vector.extract_strided_slice %124 {offsets = [2, 0], sizes = [1, 32], strides = [1, 1]} : vector<10x128xf32> to vector<1x32xf32>
    %128 = vector.extract_strided_slice %124 {offsets = [3, 0], sizes = [1, 32], strides = [1, 1]} : vector<10x128xf32> to vector<1x32xf32>
    %129 = vector.extract_strided_slice %124 {offsets = [4, 0], sizes = [1, 32], strides = [1, 1]} : vector<10x128xf32> to vector<1x32xf32>
    %130 = vector.extract_strided_slice %124 {offsets = [5, 0], sizes = [1, 32], strides = [1, 1]} : vector<10x128xf32> to vector<1x32xf32>
    %131 = vector.extract_strided_slice %124 {offsets = [6, 0], sizes = [1, 32], strides = [1, 1]} : vector<10x128xf32> to vector<1x32xf32>
    %132 = vector.extract_strided_slice %124 {offsets = [7, 0], sizes = [1, 32], strides = [1, 1]} : vector<10x128xf32> to vector<1x32xf32>
    %133 = vector.extract_strided_slice %124 {offsets = [8, 0], sizes = [1, 64], strides = [1, 1]} : vector<10x128xf32> to vector<1x64xf32>
    %134 = vector.extract_strided_slice %124 {offsets = [9, 0], sizes = [1, 32], strides = [1, 1]} : vector<10x128xf32> to vector<1x32xf32>
    %cst_67 = arith.constant dense<0.000000e+00> : vector<8x32xf32>
    %135 = tpu.matmul %110, %112, %cst_67 {dimension_numbers = #tpu.dot_dimension_numbers<[1], [0], [0], [1], [0, 0, 1, 1], [], []>} : vector<8x32xf32>, vector<32x32xf32>, vector<8x32xf32> -> vector<8x32xf32>
    %136 = vector.broadcast %125 : vector<1x32xf32> to vector<8x32xf32>
    %137 = arith.addf %135, %136 : vector<8x32xf32>
    %cst_68 = arith.constant dense<0.000000e+00> : vector<8x32xf32>
    %138 = tpu.matmul %110, %114, %cst_68 {dimension_numbers = #tpu.dot_dimension_numbers<[1], [0], [0], [1], [0, 0, 1, 1], [], []>} : vector<8x32xf32>, vector<32x32xf32>, vector<8x32xf32> -> vector<8x32xf32>
    %139 = vector.broadcast %126 : vector<1x32xf32> to vector<8x32xf32>
    %140 = arith.addf %138, %139 : vector<8x32xf32>
    %cst_69 = arith.constant dense<0.000000e+00> : vector<8x32xf32>
    %141 = tpu.matmul %110, %116, %cst_69 {dimension_numbers = #tpu.dot_dimension_numbers<[1], [0], [0], [1], [0, 0, 1, 1], [], []>} : vector<8x32xf32>, vector<32x32xf32>, vector<8x32xf32> -> vector<8x32xf32>
    %142 = vector.broadcast %127 : vector<1x32xf32> to vector<8x32xf32>
    %143 = arith.addf %141, %142 : vector<8x32xf32>
    %144 = vector.shape_cast %137 : vector<8x32xf32> to vector<8x4x8xf32>
    %145 = tpu.transpose %144, [1, 0, 2] : vector<8x4x8xf32> -> vector<4x8x8xf32>
    %146 = vector.shape_cast %140 : vector<8x32xf32> to vector<8x4x8xf32>
    %147 = tpu.transpose %146, [1, 0, 2] : vector<8x4x8xf32> -> vector<4x8x8xf32>
    %148 = vector.shape_cast %143 : vector<8x32xf32> to vector<8x4x8xf32>
    %149 = tpu.transpose %148, [1, 0, 2] : vector<8x4x8xf32> -> vector<4x8x8xf32>
    "tpu.trace_start"() <{level = 10 : i32, message = "hqd,hkd->hqk"}> : () -> ()
    %cst_70 = arith.constant dense<0.000000e+00> : vector<4x8x8xf32>
    %150 = tpu.matmul %145, %147, %cst_70 {dimension_numbers = #tpu.dot_dimension_numbers<[2], [2], [1], [1], [0, 0, 0, 1, 1, 1], [0], [0]>} : vector<4x8x8xf32>, vector<4x8x8xf32>, vector<4x8x8xf32> -> vector<4x8x8xf32>
    "tpu.trace_stop"() : () -> ()
    %cst_71 = arith.constant dense<0xFF800000> : vector<4x8xf32>
    %151 = vector.multi_reduction <maximumf>, %150, %cst_71 [2] : vector<4x8x8xf32> to vector<4x8xf32>
    %152 = vector.shape_cast %151 : vector<4x8xf32> to vector<4x8x1xf32>
    %153 = vector.broadcast %152 : vector<4x8x1xf32> to vector<4x8x8xf32>
    %154 = arith.subf %150, %153 : vector<4x8x8xf32>
    %155 = math.exp %154 : vector<4x8x8xf32>
    %cst_72 = arith.constant dense<0.000000e+00> : vector<4x8xf32>
    %156 = vector.multi_reduction <add>, %155, %cst_72 [2] : vector<4x8x8xf32> to vector<4x8xf32>
    %157 = vector.shape_cast %156 : vector<4x8xf32> to vector<4x8x1xf32>
    "tpu.trace_start"() <{level = 10 : i32, message = "hqk,hkd->hqd"}> : () -> ()
    %cst_73 = arith.constant dense<0.000000e+00> : vector<4x8x8xf32>
    %158 = tpu.matmul %155, %149, %cst_73 {dimension_numbers = #tpu.dot_dimension_numbers<[2], [1], [1], [2], [0, 0, 0, 1, 1, 2], [0], [0]>} : vector<4x8x8xf32>, vector<4x8x8xf32>, vector<4x8x8xf32> -> vector<4x8x8xf32>
    "tpu.trace_stop"() : () -> ()
    %159 = vector.broadcast %157 : vector<4x8x1xf32> to vector<4x8x8xf32>
    %160 = arith.divf %158, %159 : vector<4x8x8xf32>
    %161 = tpu.transpose %160, [1, 0, 2] : vector<4x8x8xf32> -> vector<8x4x8xf32>
    %162 = vector.shape_cast %161 : vector<8x4x8xf32> to vector<8x32xf32>
    %cst_74 = arith.constant dense<0.000000e+00> : vector<8x32xf32>
    %163 = tpu.matmul %162, %118, %cst_74 {dimension_numbers = #tpu.dot_dimension_numbers<[1], [0], [0], [1], [0, 0, 1, 1], [], []>} : vector<8x32xf32>, vector<32x32xf32>, vector<8x32xf32> -> vector<8x32xf32>
    %164 = vector.broadcast %128 : vector<1x32xf32> to vector<8x32xf32>
    %165 = arith.addf %163, %164 : vector<8x32xf32>
    %166 = arith.addf %110, %165 : vector<8x32xf32>
    %cst_75 = arith.constant dense<0.000000e+00> : vector<8xf32>
    %167 = vector.multi_reduction <add>, %166, %cst_75 [1] : vector<8x32xf32> to vector<8xf32>
    %168 = vector.shape_cast %167 : vector<8xf32> to vector<8x1xf32>
    %cst_76 = arith.constant 3.200000e+01 : f32
    %169 = vector.broadcast %cst_76 : f32 to vector<8x1xf32>
    %170 = arith.divf %168, %169 : vector<8x1xf32>
    %171 = arith.mulf %166, %166 : vector<8x32xf32>
    %cst_77 = arith.constant dense<0.000000e+00> : vector<8xf32>
    %172 = vector.multi_reduction <add>, %171, %cst_77 [1] : vector<8x32xf32> to vector<8xf32>
    %173 = vector.shape_cast %172 : vector<8xf32> to vector<8x1xf32>
    %cst_78 = arith.constant 3.200000e+01 : f32
    %174 = vector.broadcast %cst_78 : f32 to vector<8x1xf32>
    %175 = arith.divf %173, %174 : vector<8x1xf32>
    %176 = arith.mulf %170, %170 : vector<8x1xf32>
    %177 = arith.subf %175, %176 : vector<8x1xf32>
    %cst_79 = arith.constant 9.99999974E-6 : f32
    %178 = vector.broadcast %cst_79 : f32 to vector<8x1xf32>
    %179 = arith.addf %177, %178 : vector<8x1xf32>
    %180 = math.rsqrt %179 : vector<8x1xf32>
    %181 = vector.broadcast %170 : vector<8x1xf32> to vector<8x32xf32>
    %182 = arith.subf %166, %181 : vector<8x32xf32>
    %183 = vector.broadcast %180 : vector<8x1xf32> to vector<8x32xf32>
    %184 = arith.mulf %182, %183 : vector<8x32xf32>
    %185 = vector.broadcast %129 : vector<1x32xf32> to vector<8x32xf32>
    %186 = arith.mulf %184, %185 : vector<8x32xf32>
    %187 = vector.broadcast %130 : vector<1x32xf32> to vector<8x32xf32>
    %188 = arith.addf %186, %187 : vector<8x32xf32>
    %cst_80 = arith.constant dense<0.000000e+00> : vector<8x64xf32>
    %189 = tpu.matmul %188, %120, %cst_80 {dimension_numbers = #tpu.dot_dimension_numbers<[1], [0], [0], [1], [0, 0, 1, 1], [], []>} : vector<8x32xf32>, vector<32x64xf32>, vector<8x64xf32> -> vector<8x64xf32>
    %190 = vector.broadcast %133 : vector<1x64xf32> to vector<8x64xf32>
    %191 = arith.addf %189, %190 : vector<8x64xf32>
    %cst_81 = arith.constant 0.000000e+00 : f32
    %192 = vector.broadcast %cst_81 : f32 to vector<8x64xf32>
    %193 = arith.maximumf %191, %192 : vector<8x64xf32>
    %cst_82 = arith.constant dense<0.000000e+00> : vector<8x32xf32>
    %194 = tpu.matmul %193, %122, %cst_82 {dimension_numbers = #tpu.dot_dimension_numbers<[1], [0], [0], [1], [0, 0, 1, 1], [], []>} : vector<8x64xf32>, vector<64x32xf32>, vector<8x32xf32> -> vector<8x32xf32>
    %195 = vector.broadcast %134 : vector<1x32xf32> to vector<8x32xf32>
    %196 = arith.addf %194, %195 : vector<8x32xf32>
    %197 = arith.addf %188, %196 : vector<8x32xf32>
    %cst_83 = arith.constant dense<0.000000e+00> : vector<8xf32>
    %198 = vector.multi_reduction <add>, %197, %cst_83 [1] : vector<8x32xf32> to vector<8xf32>
    %199 = vector.shape_cast %198 : vector<8xf32> to vector<8x1xf32>
    %cst_84 = arith.constant 3.200000e+01 : f32
    %200 = vector.broadcast %cst_84 : f32 to vector<8x1xf32>
    %201 = arith.divf %199, %200 : vector<8x1xf32>
    %202 = arith.mulf %197, %197 : vector<8x32xf32>
    %cst_85 = arith.constant dense<0.000000e+00> : vector<8xf32>
    %203 = vector.multi_reduction <add>, %202, %cst_85 [1] : vector<8x32xf32> to vector<8xf32>
    %204 = vector.shape_cast %203 : vector<8xf32> to vector<8x1xf32>
    %cst_86 = arith.constant 3.200000e+01 : f32
    %205 = vector.broadcast %cst_86 : f32 to vector<8x1xf32>
    %206 = arith.divf %204, %205 : vector<8x1xf32>
    %207 = arith.mulf %201, %201 : vector<8x1xf32>
    %208 = arith.subf %206, %207 : vector<8x1xf32>
    %cst_87 = arith.constant 9.99999974E-6 : f32
    %209 = vector.broadcast %cst_87 : f32 to vector<8x1xf32>
    %210 = arith.addf %208, %209 : vector<8x1xf32>
    %211 = math.rsqrt %210 : vector<8x1xf32>
    %212 = vector.broadcast %201 : vector<8x1xf32> to vector<8x32xf32>
    %213 = arith.subf %197, %212 : vector<8x32xf32>
    %214 = vector.broadcast %211 : vector<8x1xf32> to vector<8x32xf32>
    %215 = arith.mulf %213, %214 : vector<8x32xf32>
    %216 = vector.broadcast %131 : vector<1x32xf32> to vector<8x32xf32>
    %217 = arith.mulf %215, %216 : vector<8x32xf32>
    %218 = vector.broadcast %132 : vector<1x32xf32> to vector<8x32xf32>
    %219 = arith.addf %217, %218 : vector<8x32xf32>
    %c0_88 = arith.constant 0 : index
    %c0_89 = arith.constant 0 : index
    %220 = vector.load %arg6[%c0_88, %c0_89] : memref<2x32xf32, #tpu.memory_space<vmem>>, vector<1x32xf32>
    %c1_90 = arith.constant 1 : index
    %c0_91 = arith.constant 0 : index
    %221 = vector.load %arg6[%c1_90, %c0_91] : memref<2x32xf32, #tpu.memory_space<vmem>>, vector<1x32xf32>
    %cst_92 = arith.constant dense<0.000000e+00> : vector<8xf32>
    %222 = vector.multi_reduction <add>, %219, %cst_92 [1] : vector<8x32xf32> to vector<8xf32>
    %223 = vector.shape_cast %222 : vector<8xf32> to vector<8x1xf32>
    %cst_93 = arith.constant 3.200000e+01 : f32
    %224 = vector.broadcast %cst_93 : f32 to vector<8x1xf32>
    %225 = arith.divf %223, %224 : vector<8x1xf32>
    %226 = arith.mulf %219, %219 : vector<8x32xf32>
    %cst_94 = arith.constant dense<0.000000e+00> : vector<8xf32>
    %227 = vector.multi_reduction <add>, %226, %cst_94 [1] : vector<8x32xf32> to vector<8xf32>
    %228 = vector.shape_cast %227 : vector<8xf32> to vector<8x1xf32>
    %cst_95 = arith.constant 3.200000e+01 : f32
    %229 = vector.broadcast %cst_95 : f32 to vector<8x1xf32>
    %230 = arith.divf %228, %229 : vector<8x1xf32>
    %231 = arith.mulf %225, %225 : vector<8x1xf32>
    %232 = arith.subf %230, %231 : vector<8x1xf32>
    %cst_96 = arith.constant 9.99999974E-6 : f32
    %233 = vector.broadcast %cst_96 : f32 to vector<8x1xf32>
    %234 = arith.addf %232, %233 : vector<8x1xf32>
    %235 = math.rsqrt %234 : vector<8x1xf32>
    %236 = vector.broadcast %225 : vector<8x1xf32> to vector<8x32xf32>
    %237 = arith.subf %219, %236 : vector<8x32xf32>
    %238 = vector.broadcast %235 : vector<8x1xf32> to vector<8x32xf32>
    %239 = arith.mulf %237, %238 : vector<8x32xf32>
    %240 = vector.broadcast %220 : vector<1x32xf32> to vector<8x32xf32>
    %241 = arith.mulf %239, %240 : vector<8x32xf32>
    %242 = vector.broadcast %221 : vector<1x32xf32> to vector<8x32xf32>
    %243 = arith.addf %241, %242 : vector<8x32xf32>
    %c0_97 = arith.constant 0 : index
    %c0_98 = arith.constant 0 : index
    %c0_99 = arith.constant 0 : index
    %244 = vector.load %arg7[%c0_97, %c0_98, %c0_99] : memref<1x8x32xf32, #tpu.memory_space<vmem>>, vector<1x8x32xf32>
    %245 = vector.shape_cast %244 : vector<1x8x32xf32> to vector<8x32xf32>
    %246 = vector.shape_cast %243 : vector<8x32xf32> to vector<1x8x32xf32>
    tpu.vector_store %arg7[%c0_97, %c0_98, %c0_99], %246 {strides = array<i32>} : memref<1x8x32xf32, #tpu.memory_space<vmem>>, vector<1x8x32xf32>,
    return
  }
  func.func @transform_0(%arg0: i32) -> (i32, i32) {
    %c0_i32 = arith.constant 0 : i32
    %c0_i32_0 = arith.constant 0 : i32
    %c0_i32_1 = arith.constant 0 : i32
    return %c0_i32, %c0_i32_0 : i32, i32
  }
  func.func @transform_1(%arg0: i32) -> (i32, i32, i32, i32) {
    %c0_i32 = arith.constant 0 : i32
    %c0_i32_0 = arith.constant 0 : i32
    %c0_i32_1 = arith.constant 0 : i32
    %c0_i32_2 = arith.constant 0 : i32
    %c0_i32_3 = arith.constant 0 : i32
    return %c0_i32, %c0_i32_0, %c0_i32_1, %c0_i32_2 : i32, i32, i32, i32
  }
  func.func @transform_2(%arg0: i32) -> (i32, i32, i32) {
    %c0_i32 = arith.constant 0 : i32
    %c0_i32_0 = arith.constant 0 : i32
    %c0_i32_1 = arith.constant 0 : i32
    %c0_i32_2 = arith.constant 0 : i32
    return %c0_i32, %c0_i32_0, %c0_i32_1 : i32, i32, i32
  }
  func.func @transform_3(%arg0: i32) -> (i32, i32, i32) {
    %c0_i32 = arith.constant 0 : i32
    %c0_i32_0 = arith.constant 0 : i32
    %c0_i32_1 = arith.constant 0 : i32
    %c0_i32_2 = arith.constant 0 : i32
    return %c0_i32, %c0_i32_0, %c0_i32_1 : i32, i32, i32
  }
  func.func @transform_4(%arg0: i32) -> (i32, i32, i32) {
    %c0_i32 = arith.constant 0 : i32
    %c0_i32_0 = arith.constant 0 : i32
    %c0_i32_1 = arith.constant 0 : i32
    %c0_i32_2 = arith.constant 0 : i32
    return %c0_i32, %c0_i32_0, %c0_i32_1 : i32, i32, i32
  }
  func.func @transform_5(%arg0: i32) -> (i32, i32) {
    %c0_i32 = arith.constant 0 : i32
    %c0_i32_0 = arith.constant 0 : i32
    %c0_i32_1 = arith.constant 0 : i32
    return %c0_i32, %c0_i32_0 : i32, i32
  }
  func.func @transform_6(%arg0: i32) -> (i32, i32, i32) {
    %c0_i32 = arith.constant 0 : i32
    %c0_i32_0 = arith.constant 0 : i32
    %c0_i32_1 = arith.constant 0 : i32
    return %arg0, %c0_i32, %c0_i32_0 : i32, i32, i32
  }
}

</mosaic_0001>

<bundles_post_ra>
// kernel: tpu_custom_call.1
= control target key start
LH: loop header
LB: loop body
LE: loop exit
PB: predicated region body
PF: predicated region fallthrough
CT: control target
= control target key end

     0   :  { %11 = vsyncpa [#allocation3], 0  ;;  %s5285_s0 = inlined_call_operand.vmem [shape: f32[16,32], index: 0, kind: input, shape index: {}]   ;;  %s5286_s1 = inlined_call_operand.hbm [shape: f32[2,4,32,32], index: 1, kind: input, shape index: {}]   ;;  %s5287_s2 = inlined_call_operand.vmem [shape: f32[2,32,64], index: 2, kind: input, shape index: {}]   ;;  %s5288_s3 = inlined_call_operand.vmem [shape: f32[2,64,32], index: 3, kind: input, shape index: {}]   ;;  %s5289_s4 = inlined_call_operand.vmem [shape: f32[2,10,128], index: 4, kind: input, shape index: {}]   ;;  %s5290_s5 = inlined_call_operand.vmem [shape: f32[2,32], index: 5, kind: input, shape index: {}]   ;;  %s5291_s6 = inlined_call_operand.hbm [shape: f32[2,8,32], index: 6, kind: output, shape index: {}]  }
   0x1   :  { %12 = vsyncpa [#allocation4], 0 }
   0x2   :  { %14 = vsyncpa [#allocation4 + $0x1], 0  ;;  %s4642_s21 = smov 0   ;;  %s4644_s22 = smov 0  }
   0x3   :  { %s4646_s23 = smov 0   ;;  %s4648_s24 = smov 0  }
   0x4 LB: > { %s4663_s25 = sadd.s32 4294967295, %s4590_s24   ;;  %s3901_s26 = sadd.s32 4294967294, %s4590_s24   ;;  %s4590_s24 = sphi %s4648_s24, %s5307_s24   ;;  %s4586_s23 = sphi %s4646_s23, %s5306_s23   ;;  %s4582_s22 = sphi %s4644_s22, %s5305_s22   ;;  %s4578_s21 = sphi %s4642_s21, %s5304_s21  }
   0x5   : > { %s4667_s27 = sadd.s32 1, %s4590_s24   ;;  %s153_s28 = sadd.s32 1, %s4586_s23 }
   0x6   : > { %s150_s29 = ssub.s32 %s4590_s24, %s4667_s27  ;;  %p163_p0 = scmp.ne.s32.totalorder %s4586_s23, %s4582_s22 }
   0x7   : > { %p151_p1 = scmp.eq.s32.totalorder %s150_s29, 0  ;;  %p164_p2 = scmp.eq.s32.totalorder %s4663_s25, 1 }
   0x8   : > { %p169_p3 = scmp.ne.s32.totalorder %s4582_s22, %s4578_s21  ;;  %p170_p4 = scmp.eq.s32.totalorder %s3901_s26, 1 }
   0x9   : > { %s4678_s30 = scalar_select %p151_p1, %s4586_s23, %s153_s28  }
   0xa   : > { %p4680_p5 = por %p164_p2, %p163_p0  ;;  %p4684_p6 = por %p170_p4, %p169_p3 }
   0xb   : > { %p3902_p7 = scmp.ge.s32.totalorder %s4590_s24, 1  ;;  %p177_p8 = scmp.lt.s32.totalorder %s4590_s24, 3 }
   0xc   : > { %s5295_s7 = scalar_select %p4680_p5, 1, 0 }
   0xd   : > { %s5296_s8 = scalar_select %p4684_p6, 1, 0 }
   0xe   : > { %p5292_p9 = scmp.eq.s32.totalorder %s4663_s25, 0  ;;  %p4691_p10 = pnand %p3902_p7, %p177_p8 }
   0xf   : > { %s4592_s10 = smov [#allocation2]   ;;  %s4496_s15 = scalar_lea.hbm %s5286_s1, 4096 }
  0x10   : > { %s5297_s9 = scalar_select %p4691_p10, 1, 0 }
  0x11   : > { %s192_s11 = sshll.u32 %s4592_s10, 4  ;;  %p4397_p11 = pneg %p4691_p10  ;;  %s193_s11 = int_to_ptr.vmem [resolvable:$true] %s192_s11 }
  0x12   : > { %p4497_p13 = scmp.ne.s32.totalorder %s5286_s1, %s4496_s15  ;;  %p4503_p3 = scmp.lt.u32.totalorder %s4496_s15, %s5286_s1 }
  0x13   : > { %p4699_p12 = pnand %p5292_p9, %p4397_p11 }
  0x15   : > { %p4498_p0 = pneg %p4699_p12 }
  0x17   : > { %p4499_p1 = pnand %p4498_p0, %p4497_p13 }
  0x19   : > { %p4500_p2 = pneg %p4499_p1 }
  0x1b   : > { %p4505_p4 = pnand %p4503_p3, %p4500_p2 }
  0x1d   : > { %4508 = shalt.err (!%p4505_p4)
}
  0x1e   : > { %s4509_s20 = scalar_lea.vmem %s193_s11, 4096  ;;  %p4517_p9 = scmp.lt.s32.totalorder %s193_s11, %s193_s11 }
  0x1f   : > { %p4510_p7 = scmp.ne.s32.totalorder %s193_s11, %s4509_s20  ;;  %p4518_p6 = scmp.lt.s32.totalorder %s4509_s20, %s4509_s20 }
  0x21   : > { %p4512_p8 = pnand %p4510_p7, %p4498_p0  ;;  %p4519_p5 = por %p4518_p6, %p4517_p9 }
  0x23   : > { %p4513_p11 = pneg %p4512_p8 }
  0x25   : > { %p4520_p10 = pnand %p4519_p5, %p4513_p11 }
  0x27   : > { %4523 = shalt.err (!%p4520_p10)
}
  0x28   : > { %s4593_s26 = smov 128   ;;  %s4594_s28 = smov 8  }
  0x29   : > { %4400 = dma.hbm_to_vmem [thread:$0]  (!%p4699_p12), %s5286_s1, 4096, %s193_s11, [#allocation3], %s4593_s26, %s4593_s26, %s4594_s28  }
  0x2a   : > { %p5299_p13 = scmp.ne.s32.totalorder %s5297_s9, 0 }
  0x2b   : > { %p5300_p1 = scmp.eq.s32.totalorder (!%p5299_p13), %s4663_s25, 0 }
  0x2c   : > { %220 = sbr.rel (%p5299_p13) target bundleno = 4428 (0x114c), region = 44 }
  0x33   : > { %4569 = dma.done.wait (%p5300_p1), [#allocation3], 4096   ;;  %p5301_p0 = pmov %p5300_p1 }
  0x34   : > { %v4595_v0 = vmov 0.0|0.0   ;;  %vm4596_vm0 = vmmov 0   ;;  %v4597_v1 = vmov 0.0   ;;  %v247_v2 = vld [vmem:[#allocation2] sm:$0xff]  ;;  %v248_v3 = vld [vmem:[#allocation2 + $0x8] sm:$0xff]  ;;  %v249_v4 = vld [vmem:[#allocation2 + $0x10] sm:$0xff]  ;;  %s245_s12 = scalar_lea.vmem %s5285_s0, %s4663_s25  ;;  %v280_v21 = vlaneseq }
  0x35   : > { %4571 = vsyncadd (%p5301_p0), [#allocation3], 4294963200  ;;  %4307 = vmatprep.subr.bf16.mxu1 %v4595_v0  ;;  %4087 = vmatprep.mubr.msk.f32.mxu1 %vm4596_vm0, %v4597_v1  ;;  %v4308_v5 = vpack.c.bf16 %v248_v3, %v247_v2  ;;  %v250_v6 = vld [vmem:[#allocation2 + $0x18] sm:$0xff]  ;;  %v252_v8 = vld [vmem:[#allocation2 + $0x20] sm:$0xff]  ;;  %vm284_vm1 = vcmask 261120   ;;  %s4598_s15 = smov 120  }
  0x36   : > { %4319 = vmatprep.subr.bf16.mxu0 %v4595_v0  ;;  %4109 = vmatprep.mubr.msk.f32.mxu0 %vm4596_vm0, %v4597_v1  ;;  %v4311_v7 = vpack.c.bf16 %v250_v6, %v249_v4  ;;  %v253_v9 = vld [vmem:[#allocation2 + $0x28] sm:$0xff]  ;;  %v254_v12 = vld [vmem:[#allocation2 + $0x30] sm:$0xff]  ;;  %v255_v13 = vld [vmem:[#allocation2 + $0x38] sm:$0xff]  ;;  %v4755_v22 = vshrl.u32 %v280_v21, 7  ;;  %s4599_s16 = smov 104   ;;  %s4600_s17 = smov 112  }
  0x37   : > { %4309 = vmatpush3.bf16.msra.mxu1 %v4308_v5  ;;  %v4736_v10 = vld [vmem:[%s245_s12] ss:$2 sm:$0xff]  ;;  %v4314_v11 = vpack.c.bf16 %v253_v9, %v252_v8  ;;  %v4317_v14 = vpack.c.bf16 %v255_v13, %v254_v12  ;;  %v259_v17 = vld [vmem:[#allocation2 + $0x50] sm:$0xff]  ;;  %v260_v19 = vld [vmem:[#allocation2 + $0x58] sm:$0xff]  ;;  %v4601_v39 = vmov 1983009808  }
  0x38   : > { %4310 = vmatprep.subr.bf16.mxu1 %v4595_v0  ;;  %v257_v15 = vld [vmem:[#allocation2 + $0x40] sm:$0xff]  ;;  %v258_v16 = vld [vmem:[#allocation2 + $0x48] sm:$0xff]  ;;  %v4323_v20 = vpack.c.bf16 %v260_v19, %v259_v17  ;;  %v4758_v23 = vsub.s32 0, %v4755_v22  ;;  %v4768_v29 = vsub.s32 1, %v4755_v22  ;;  %v434_v34 = vsub.s32 2, %v4755_v22  ;;  %s4603_s18 = smov 16  }
  0x39   : > { %v4320_v18 = vpack.c.bf16 %v258_v16, %v257_v15  ;;  %v4763_v24 = vld [vmem:[%s5289_s4] sm:$0xff]  ;;  %v519_v40 = vunpack.c.l.s4 %v4601_v39  ;;  %v4602_v42 = vmov 1934713408   ;;  %vm944_vm2 = vcmask 64512   ;;  %s4604_s19 = smov 8   ;;  %s4605_s20 = smov 24  }
  0x3a   : > { %v283_v25 = vrot.slane %v4763_v24, %v4758_v23  ;;  %v361_v30 = vrot.slane %v4763_v24, %v4768_v29  ;;  %v435_v35 = vrot.slane %v4763_v24, %v434_v34  ;;  %v551_v43 = vunpack.c.l.s4 %v4602_v42  ;;  %s242_s12 = sand.u32 1, %s4582_s22   ;;  %p5302_p6 = scmp.ne.s32.totalorder %s5295_s7, 0 }
  0x3b   : > { %4312 = vmatpush3.bf16.msra.mxu1 %v4311_v7  ;;  %4321 = vmatpush3.bf16.msra.mxu0 %v4320_v18  ;;  %v520_v44 = vunpack.c.0.s8 %v519_v40  ;;  %vm1734_vm3 = vcmask 130048   ;;  %vm1736_vm4 = vcmask 195584   ;;  %vm1924_vm5 = vcmask 523264   ;;  %s3906_s13 = sshll.u32 %s242_s12, 3  ;;  %s3828_s10 = scalar_lea.sflag [#allocation4], %s242_s12 }
  0x3c   : > { %4313 = vmatprep.subr.bf16.mxu1 %v4595_v0  ;;  %4322 = vmatprep.subr.bf16.mxu0 %v4595_v0  ;;  %v552_v47 = vunpack.c.0.s8 %v551_v43 }
  0x3d   : > { %v4787_v48 = vsub.s32 %v520_v44, %v4755_v22 }
  0x3e   : > { %4088 = vmatmul.mubr.msk.f32.vlgmr.msra.gmra.mrb[0].mxu1 %vm284_vm1, %v4736_v10  ;;  %v4790_v55 = vsub.s32 %v552_v47, %v4755_v22 }
  0x3f   : > { %4315 = vmatpush3.bf16.msra.mxu1 %v4314_v11  ;;  %4098 = vmatprep.mubr.msk.f32.mxu1 %vm4596_vm0, %v4597_v1 }
  0x40   : > { %4316 = vmatprep.subr.bf16.mxu1 %v4595_v0  ;;  %4324 = vmatpush3.bf16.msra.mxu0 %v4323_v20 }
  0x41   : > { %4122 = vmatprep.subr.mxu0 %v4597_v1 }
  0x43   : > { %4318 = vmatpush3.bf16.msra.mxu1 %v4317_v14  ;;  %4110 = vmatmul.mubr.msk.f32.vlgmr.msra.gmra.mrb[0].mxu0 %vm284_vm1, %v4736_v10 }
  0x44   : > { %4112 = vmatprep.subr.mxu1 %v4597_v1  ;;  %4124 = vmatprep.mubr.msk.f32.mxu0 %vm4596_vm0, %v4597_v1 }
  0x46   : > { %4099 = vmatmul.mubr.msk.f32.vlgmr.msra.gmra.mrb[2].mxu1 %vm284_vm1, %v4736_v10 }
  0x47   : > { %4114 = vmatprep.mubr.msk.f32.mxu1 %vm4596_vm0, %v4597_v1 }
 0x111   : > { %v354_v26 = vpop.f32.mrb[0].mxu1 }
 0x112   : > { %v355_v27 = vadd.f32 %v354_v26, %v283_v25  ;;  %v4089_v28 = vpop.f32.mrb[1].mxu1 }
 0x114   : > { %507 = vrot.lane.b32.xlu1 %v355_v27, %s4598_s15 }
 0x116   : > { %v502_v36 = vpop.f32.mrb[0].mxu0 }
 0x117   : > { %v4782_v37 = vadd.f32 %v502_v36, %v435_v35  ;;  %v4111_v38 = vpop.f32.mrb[1].mxu0 }
 0x119   : > { %v428_v31 = vpop.f32.mrb[2].mxu1 }
 0x11a   : > { %v429_v32 = vadd.f32 %v428_v31, %v361_v30  ;;  %v4100_v33 = vpop.f32.mrb[3].mxu1 }
 0x11c   : > { %659 = vrot.lane.b32.xlu1 %v429_v32, %s4599_s16  ;;  %653 = vrot.lane.b32.xlu0 %v429_v32, %s4598_s15 }
 0x120   : > { %513 = vrot.lane.b32.xlu1 %v355_v27, %s4599_s16  ;;  %656 = vrot.lane.b32.xlu0 %v429_v32, %s4600_s17 }
 0x124   : > { %510 = vrot.lane.b32.xlu0 %v355_v27, %s4600_s17  ;;  %799 = vrot.lane.b32.xlu1 %v4782_v37, %s4598_s15 }
 0x186   : > { %v508_v41 = vpop.permute.xlu1 %507 }
 0x18e   : > { %v660_v45 = vpop.permute.xlu1 %659  ;;  %v654_v46 = vpop.permute.xlu0 %653 }
 0x18f   : > { %v678_v49 = vcombine.low %v654_v46, %v660_v45  ;;  %v679_v50 = vcombine.high %v654_v46, %v660_v45 }
 0x191   : > { %v686_v56 = vrot.slane %v678_v49, %v4787_v48  ;;  %v693_v57 = vrot.slane %v679_v50, %v4787_v48 }
 0x192   : > { %v657_v51 = vpop.permute.xlu0 %656  ;;  %v514_v52 = vpop.permute.xlu1 %513 }
 0x193   : > { %v662_v53 = vcombine.low %v429_v32, %v657_v51  ;;  %v663_v54 = vcombine.high %v429_v32, %v657_v51  ;;  %v532_v60 = vcombine.low %v508_v41, %v514_v52  ;;  %v533_v61 = vcombine.high %v508_v41, %v514_v52 }
 0x195   : > { %v670_v58 = vrot.slane %v662_v53, %v4787_v48  ;;  %v677_v59 = vrot.slane %v663_v54, %v4787_v48  ;;  %v540_v12 = vrot.slane %v532_v60, %v4787_v48  ;;  %v547_v13 = vrot.slane %v533_v61, %v4787_v48 }
 0x196   : > { %v511_v62 = vpop.permute.xlu0 %510 }
 0x197   : > { %v694_v63 = vcombine.low %v670_v58, %v686_v56  ;;  %v695_v2 = vcombine.high %v670_v58, %v686_v56  ;;  %v710_v3 = vcombine.low %v677_v59, %v693_v57  ;;  %v711_v4 = vcombine.high %v677_v59, %v693_v57 }
 0x198   : > { %v516_v5 = vcombine.low %v355_v27, %v511_v62  ;;  %v517_v6 = vcombine.high %v355_v27, %v511_v62 }
 0x199   : > { %v702_v7 = vrot.slane %v694_v63, %v4790_v55  ;;  %v709_v8 = vrot.slane %v695_v2, %v4790_v55  ;;  %v718_v9 = vrot.slane %v710_v3, %v4790_v55  ;;  %v725_v11 = vrot.slane %v711_v4, %v4790_v55 }
 0x19a   : > { %v524_v14 = vrot.slane %v516_v5, %v4787_v48  ;;  %v531_v15 = vrot.slane %v517_v6, %v4787_v48 }
 0x19b   : > { %v730_v16 = vcombine.low %v702_v7, %v709_v8  ;;  %v3912_v17 = vcombine.high %v702_v7, %v709_v8  ;;  %v746_v18 = vcombine.low %v718_v9, %v725_v11  ;;  %v3913_v19 = vcombine.high %v718_v9, %v725_v11 }
 0x19c   : > { %v548_v20 = vcombine.low %v524_v14, %v540_v12  ;;  %v549_v21 = vcombine.high %v524_v14, %v540_v12  ;;  %v564_v25 = vcombine.low %v531_v15, %v547_v13  ;;  %v565_v26 = vcombine.high %v531_v15, %v547_v13 }
 0x19d   : > { %v737_v27 = vrot.slane %v730_v16, %v4787_v48  ;;  %v745_v28 = vrot.slane %v3912_v17, %v4787_v48  ;;  %v753_v30 = vrot.slane %v746_v18, %v4787_v48  ;;  %v761_v31 = vrot.slane %v3913_v19, %v4787_v48 }
 0x19e   : > { %v556_v32 = vrot.slane %v548_v20, %v4790_v55  ;;  %v563_v33 = vrot.slane %v549_v21, %v4790_v55  ;;  %v572_v35 = vrot.slane %v564_v25, %v4790_v55  ;;  %v579_v36 = vrot.slane %v565_v26, %v4790_v55  ;;  %v800_v26 = vpop.permute.xlu1 %799 }
 0x19f   : > { %v762_v38 = vcombine.low %v737_v27, %v745_v28  ;;  %v763_v39 = vcombine.high %v737_v27, %v745_v28  ;;  %v778_v40 = vcombine.low %v753_v30, %v761_v31  ;;  %v779_v41 = vcombine.high %v753_v30, %v761_v31 }
 0x1a0   : > { %v584_v42 = vcombine.low %v556_v32, %v563_v33  ;;  %v3910_v43 = vcombine.high %v556_v32, %v563_v33  ;;  %v600_v44 = vcombine.low %v572_v35, %v579_v36  ;;  %v3911_v45 = vcombine.high %v572_v35, %v579_v36 }
 0x1a1   : > { %v770_v46 = vrot.slane %v762_v38, %v4790_v55  ;;  %v786_v47 = vrot.slane %v778_v40, %v4790_v55  ;;  %v777_v49 = vrot.slane %v763_v39, %v4790_v55  ;;  %v793_v50 = vrot.slane %v779_v41, %v4790_v55 }
 0x1a2   : > { %v591_v51 = vrot.slane %v584_v42, %v4787_v48  ;;  %v599_v52 = vrot.slane %v3910_v43, %v4787_v48  ;;  %v607_v53 = vrot.slane %v600_v44, %v4787_v48  ;;  %v615_v54 = vrot.slane %v3911_v45, %v4787_v48 }
 0x1a3   : > { %v794_v56 = vcombine.low %v770_v46, %v786_v47  ;;  %v796_v57 = vcombine.low %v777_v49, %v793_v50  ;;  %v795_v6 = vcombine.high %v770_v46, %v786_v47  ;;  %v797_v8 = vcombine.high %v777_v49, %v793_v50 }
 0x1a4   : > { %v616_v58 = vcombine.low %v591_v51, %v599_v52  ;;  %v617_v59 = vcombine.high %v591_v51, %v599_v52  ;;  %v632_v60 = vcombine.low %v607_v53, %v615_v54  ;;  %v633_v61 = vcombine.high %v607_v53, %v615_v54 }
 0x1a5   : > { %4113 = vmatpush3.xpose.msk.msra.mxu1 %vm944_vm2, %v794_v56  ;;  %4123 = vmatpush3.xpose.msk.msra.mxu0 %vm944_vm2, %v796_v57 }
 0x1a6   : > { %4117 = vmatprep.subr.mxu1 %v4597_v1  ;;  %v624_v62 = vrot.slane %v616_v58, %v4790_v55  ;;  %v640_v63 = vrot.slane %v632_v60, %v4790_v55  ;;  %v631_v2 = vrot.slane %v617_v59, %v4790_v55  ;;  %v647_v3 = vrot.slane %v633_v61, %v4790_v55 }
 0x1a7   : > { %4132 = vmatprep.subr.mxu0 %v4597_v1 }
 0x1a8   : > { %v648_v4 = vcombine.low %v624_v62, %v640_v63  ;;  %v650_v5 = vcombine.low %v631_v2, %v647_v3  ;;  %v649_v7 = vcombine.high %v624_v62, %v640_v63  ;;  %v651_v9 = vcombine.high %v631_v2, %v647_v3 }
 0x1aa   : > { %4115 = vmatmul.mubr.msk.f32.vlgmr.msra.gmra.mrb[4].mxu1 %vm944_vm2, %v648_v4  ;;  %4125 = vmatmul.mubr.msk.f32.vlgmr.msra.gmra.mrb[2].mxu0 %vm944_vm2, %v650_v5 }
 0x1ab   : > { %4118 = vmatpush3.xpose.msk.msra.mxu1 %vm944_vm2, %v795_v6  ;;  %4119 = vmatprep.mubr.msk.f32.mxu1 %vm4596_vm0, %v4597_v1 }
 0x1ac   : > { %4127 = vmatprep.subr.mxu1 %v4597_v1  ;;  %4134 = vmatprep.mubr.msk.f32.mxu0 %vm4596_vm0, %v4597_v1 }
 0x1ae   : > { %4120 = vmatmul.mubr.msk.f32.vlgmr.msra.gmra.mrb[6].mxu1 %vm944_vm2, %v649_v7 }
 0x1af   : > { %4128 = vmatpush3.xpose.msk.msra.mxu1 %vm944_vm2, %v797_v8  ;;  %4129 = vmatprep.mubr.msk.f32.mxu1 %vm4596_vm0, %v4597_v1 }
 0x1b0   : > { %4137 = vmatprep.subr.mxu1 %v4597_v1 }
 0x1b2   : > { %4130 = vmatmul.mubr.msk.f32.vlgmr.msra.gmra.mrb[8].mxu1 %vm944_vm2, %v651_v9 }
 0x1b3   : > { %4139 = vmatprep.mubr.msk.f32.mxu1 %vm4596_vm0, %v4597_v1 }
 0x27d   : > { %v1017_v11 = vpop.f32.mrb[4].mxu1  ;;  %v1169_v12 = vpop.f32.mrb[2].mxu0 }
 0x27e   : > { %v4116_v13 = vpop.f32.mrb[5].mxu1  ;;  %v4126_v14 = vpop.f32.mrb[3].mxu0  ;;  %v1249_v15 = vsel %vm944_vm2, %v1017_v11, -inf  ;;  %v1255_v18 = vsel %vm944_vm2, %v1169_v12, -inf }
 0x27f   : > { %1250 = vmax.xlane.f32.xlu0 %v1249_v15 }
 0x281   : > { %v1093_v16 = vpop.f32.mrb[6].mxu1 }
 0x282   : > { %v4121_v17 = vpop.f32.mrb[7].mxu1  ;;  %v1252_v19 = vsel %vm944_vm2, %v1093_v16, -inf }
 0x283   : > { %1256 = vmax.xlane.f32.xlu0 %v1255_v18  ;;  %1253 = vmax.xlane.f32.xlu1 %v1252_v19 }
 0x285   : > { %v1245_v20 = vpop.f32.mrb[8].mxu1 }
 0x286   : > { %v4131_v21 = vpop.f32.mrb[9].mxu1  ;;  %v1258_v25 = vsel %vm944_vm2, %v1245_v20, -inf }
 0x287   : > { %1259 = vmax.xlane.f32.xlu0 %v1258_v25 }
 0x294   : > { %805 = vrot.lane.b32.xlu1 %v4782_v37, %s4599_s16 }
 0x29d   : > { %802 = vrot.lane.b32.xlu0 %v4782_v37, %s4600_s17 }
 0x30c   : > { %v1251_v27 = vpop.xlane.xlu0 %1250 }
 0x30d   : > { %v1261_v28 = vsub.f32 %v1017_v11, %v1251_v27 }
 0x30f   : > { %v1265_v30 = vmul.f32 1.442695, %v1261_v28 }
 0x310   : > { %v1257_v31 = vpop.xlane.xlu0 %1256  ;;  %v1254_v32 = vpop.xlane.xlu1 %1253 }
 0x311   : > { %4454 = vpow2.f32 %v1265_v30  ;;  %v1263_v33 = vsub.f32 %v1169_v12, %v1257_v31  ;;  %v1262_v35 = vsub.f32 %v1093_v16, %v1254_v32  ;;  %v262_v32 = vld [vmem:[#allocation2 + $0x60] sm:$0xff] }
 0x313   : > { %v1267_v36 = vmul.f32 1.442695, %v1262_v35  ;;  %v1269_v38 = vmul.f32 1.442695, %v1263_v33  ;;  %v263_v33 = vld [vmem:[#allocation2 + $0x68] sm:$0xff] }
 0x314   : > { %v806_v39 = vpop.permute.xlu1 %805  ;;  %v1260_v40 = vpop.xlane.xlu0 %1259  ;;  %v4326_v35 = vpack.c.bf16 %v263_v33, %v262_v32 }
 0x315   : > { %v1264_v41 = vsub.f32 %v1245_v20, %v1260_v40  ;;  %4456 = vpow2.f32 %v1267_v36  ;;  %v824_v42 = vcombine.low %v800_v26, %v806_v39  ;;  %v825_v43 = vcombine.high %v800_v26, %v806_v39 }
 0x316   : > { %4458 = vpow2.f32 %v1269_v38 }
 0x317   : > { %v1271_v44 = vmul.f32 1.442695, %v1264_v41  ;;  %v832_v50 = vrot.slane %v824_v42, %v4787_v48  ;;  %v839_v51 = vrot.slane %v825_v43, %v4787_v48 }
 0x318   : > { %v803_v45 = vpop.permute.xlu0 %802 }
 0x319   : > { %4460 = vpow2.f32 %v1271_v44  ;;  %v808_v46 = vcombine.low %v4782_v37, %v803_v45  ;;  %v809_v47 = vcombine.high %v4782_v37, %v803_v45 }
 0x31b   : > { %v4455_v49 = vpop.eup %4454  ;;  %v816_v52 = vrot.slane %v808_v46, %v4787_v48  ;;  %v823_v53 = vrot.slane %v809_v47, %v4787_v48 }
 0x31c   : > { %v1273_v54 = vsel %vm944_vm2, %v4455_v49, 0.0 }
 0x31d   : > { %v840_v56 = vcombine.low %v816_v52, %v832_v50  ;;  %v841_v57 = vcombine.high %v816_v52, %v832_v50  ;;  %v856_v58 = vcombine.low %v823_v53, %v839_v51  ;;  %v857_v59 = vcombine.high %v823_v53, %v839_v51  ;;  %1274 = vadd.xlane.f32.xlu1 %v1273_v54 }
 0x31f   : > { %v848_v60 = vrot.slane %v840_v56, %v4790_v55  ;;  %v855_v37 = vrot.slane %v841_v57, %v4790_v55  ;;  %v864_v61 = vrot.slane %v856_v58, %v4790_v55  ;;  %v871_v62 = vrot.slane %v857_v59, %v4790_v55  ;;  %v4457_v63 = vpop.eup %4456 }
 0x320   : > { %v4459_v6 = vpop.eup %4458  ;;  %v1276_v7 = vsel %vm944_vm2, %v4457_v63, 0.0 }
 0x321   : > { %v876_v2 = vcombine.low %v848_v60, %v855_v37  ;;  %v3914_v3 = vcombine.high %v848_v60, %v855_v37  ;;  %v892_v4 = vcombine.low %v864_v61, %v871_v62  ;;  %v3915_v5 = vcombine.high %v864_v61, %v871_v62  ;;  %1277 = vadd.xlane.f32.xlu0 %v1276_v7 }
 0x322   : > { %v1279_v19 = vsel %vm944_vm2, %v4459_v6, 0.0 }
 0x323   : > { %v4461_v8 = vpop.eup %4460  ;;  %v883_v9 = vrot.slane %v876_v2, %v4787_v48  ;;  %v891_v11 = vrot.slane %v3914_v3, %v4787_v48  ;;  %v899_v12 = vrot.slane %v892_v4, %v4787_v48  ;;  %v907_v13 = vrot.slane %v3915_v5, %v4787_v48 }
 0x324   : > { %v1282_v14 = vsel %vm944_vm2, %v4461_v8, 0.0 }
 0x325   : > { %1283 = vadd.xlane.f32.xlu1 %v1282_v14  ;;  %v908_v15 = vcombine.low %v883_v9, %v891_v11  ;;  %v924_v16 = vcombine.low %v899_v12, %v907_v13  ;;  %v909_v17 = vcombine.high %v883_v9, %v891_v11  ;;  %v925_v18 = vcombine.high %v899_v12, %v907_v13  ;;  %v265_v9 = vld [vmem:[#allocation2 + $0x78] sm:$0xff] }
 0x326   : > { %1280 = vadd.xlane.f32.xlu0 %v1279_v19 }
 0x327   : > { %v916_v20 = vrot.slane %v908_v15, %v4790_v55  ;;  %v932_v21 = vrot.slane %v924_v16, %v4790_v55  ;;  %v923_v25 = vrot.slane %v909_v17, %v4790_v55  ;;  %v939_v26 = vrot.slane %v925_v18, %v4790_v55 }
 0x329   : > { %v940_v27 = vcombine.low %v916_v20, %v932_v21  ;;  %v941_v28 = vcombine.high %v916_v20, %v932_v21  ;;  %v942_v30 = vcombine.low %v923_v25, %v939_v26  ;;  %v943_v31 = vcombine.high %v923_v25, %v939_v26 }
 0x32b   : > { %4133 = vmatpush3.msra.mxu0 %v940_v27  ;;  %4138 = vmatpush3.msra.mxu1 %v941_v28 }
 0x32c   : > { %4135 = vmatmul.mubr.msk.f32.vlgmr.msra.gmra.mrb[4].mxu0 %vm944_vm2, %v4455_v49  ;;  %4140 = vmatmul.mubr.msk.f32.vlgmr.msra.gmra.mrb[10].mxu1 %vm944_vm2, %v4457_v63 }
 0x32d   : > { %4142 = vmatprep.subr.mxu0 %v4597_v1  ;;  %4147 = vmatprep.subr.mxu1 %v4597_v1 }
 0x32e   : > { %4143 = vmatpush3.msra.mxu0 %v942_v30  ;;  %4148 = vmatpush3.msra.mxu1 %v943_v31 }
 0x32f   : > { %4144 = vmatprep.mubr.msk.f32.mxu0 %vm4596_vm0, %v4597_v1  ;;  %4149 = vmatprep.mubr.msk.f32.mxu1 %vm4596_vm0, %v4597_v1 }
 0x330   : > { %4145 = vmatmul.mubr.msk.f32.vlgmr.msra.gmra.mrb[6].mxu0 %vm944_vm2, %v4459_v6  ;;  %4150 = vmatmul.mubr.msk.f32.vlgmr.msra.gmra.mrb[12].mxu1 %vm944_vm2, %v4461_v8  ;;  %v264_v8 = vld [vmem:[#allocation2 + $0x70] sm:$0xff] }
 0x331   : > { %4325 = vmatprep.subr.bf16.mxu0 %v4595_v0  ;;  %4160 = vmatprep.mubr.msk.f32.mxu0 %vm4596_vm0, %v4597_v1  ;;  %v4329_v15 = vpack.c.bf16 %v265_v9, %v264_v8  ;;  %v275_v8 = vld [vmem:[%s5288_s3 + $0x28] sm:$0xff] }
 0x332   : > { %4331 = vmatprep.subr.bf16.mxu1 %v4595_v0  ;;  %4171 = vmatprep.mubr.msk.f32.mxu1 %vm4596_vm0, %v4597_v1 }
 0x333   : > { %4327 = vmatpush3.bf16.msra.mxu0 %v4326_v35 }
 0x334   : > { %4328 = vmatprep.subr.bf16.mxu0 %v4595_v0 }
 0x337   : > { %4330 = vmatpush3.bf16.msra.mxu0 %v4329_v15 }
 0x338   : > { %4337 = vmatprep.subr.bf16.mxu0 %v4595_v0 }
 0x3aa   : > { %v1275_v38 = vpop.xlane.xlu1 %1274 }
 0x3ab   : > { %4462 = vrcp.f32 %v1275_v38 }
 0x3ae   : > { %v1278_v36 = vpop.xlane.xlu0 %1277 }
 0x3af   : > { %4464 = vrcp.f32 %v1278_v36 }
 0x3b2   : > { %v1284_v39 = vpop.xlane.xlu1 %1283 }
 0x3b3   : > { %v1281_v40 = vpop.xlane.xlu0 %1280  ;;  %4466 = vrcp.f32 %v1284_v39 }
 0x3b4   : > { %4468 = vrcp.f32 %v1281_v40 }
 0x3b5   : > { %v4463_v43 = vpop.eup %4462 }
 0x3b9   : > { %v4465_v46 = vpop.eup %4464 }
 0x3bd   : > { %v4467_v47 = vpop.eup %4466 }
 0x3be   : > { %v4469_v49 = vpop.eup %4468 }
 0x3ff   : > { %v1354_v41 = vpop.f32.mrb[4].mxu0  ;;  %v1427_v42 = vpop.f32.mrb[10].mxu1 }
 0x400   : > { %v4136_v44 = vpop.f32.mrb[5].mxu0  ;;  %v4141_v45 = vpop.f32.mrb[11].mxu1  ;;  %v1578_v52 = vmul.f32 %v4463_v43, %v1354_v41  ;;  %v1580_v53 = vmul.f32 %v4465_v46, %v1427_v42 }
 0x403   : > { %v1500_v50 = vpop.f32.mrb[6].mxu0  ;;  %v1573_v51 = vpop.f32.mrb[12].mxu1 }
 0x404   : > { %v1582_v54 = vmul.f32 %v4469_v49, %v1500_v50  ;;  %v1584_v56 = vmul.f32 %v4467_v47, %v1573_v51  ;;  %v4146_v57 = vpop.f32.mrb[7].mxu0  ;;  %v4151_v58 = vpop.f32.mrb[13].mxu1  ;;  %v1740_v49 = vsub.s32 3, %v4755_v22 }
 0x406   : > { %v1585_v59 = vcombine.low %v1578_v52, %v1582_v54  ;;  %v1586_v60 = vcombine.high %v1578_v52, %v1582_v54  ;;  %v1601_v37 = vcombine.low %v1580_v53, %v1584_v56  ;;  %v1602_v61 = vcombine.high %v1580_v53, %v1584_v56 }
 0x407   : > { %v1741_v50 = vrot.slane %v4763_v24, %v1740_v49 }
 0x408   : > { %v1593_v62 = vrot.slane %v1585_v59, %v4787_v48  ;;  %v1600_v63 = vrot.slane %v1586_v60, %v4787_v48  ;;  %v1609_v2 = vrot.slane %v1601_v37, %v4787_v48  ;;  %v1616_v3 = vrot.slane %v1602_v61, %v4787_v48  ;;  %v266_v59 = vld [vmem:[%s5287_s2] sm:$0xff]  ;;  %v267_v60 = vld [vmem:[%s5287_s2 + $0x8] sm:$0xff]  ;;  %v269_v61 = vld [vmem:[%s5287_s2 + $0x18] sm:$0xff] }
 0x409   : > { %v4332_v37 = vpack.c.bf16 %v267_v60, %v266_v59  ;;  %v2027_v59 = vld [vmem:[#allocation2 + $0x90] sm:$0xff]  ;;  %v2028_v60 = vld [vmem:[#allocation2 + $0x98] sm:$0xff] }
 0x40a   : > { %v1617_v4 = vcombine.low %v1593_v62, %v1609_v2  ;;  %v1618_v5 = vcombine.high %v1593_v62, %v1609_v2  ;;  %v1633_v6 = vcombine.low %v1600_v63, %v1616_v3  ;;  %v1634_v7 = vcombine.high %v1600_v63, %v1616_v3  ;;  %v270_v63 = vld [vmem:[%s5288_s3] sm:$0xff]  ;;  %v271_v2 = vld [vmem:[%s5288_s3 + $0x8] sm:$0xff]  ;;  %v272_v3 = vld [vmem:[%s5288_s3 + $0x10] sm:$0xff] }
 0x40b   : > { %4333 = vmatpush3.bf16.msra.mxu1 %v4332_v37  ;;  %v2037_v37 = vld [vmem:[#allocation2 + $0xd0] sm:$0xff] }
 0x40c   : > { %v1625_v11 = vrot.slane %v1617_v4, %v4790_v55  ;;  %v1632_v12 = vrot.slane %v1618_v5, %v4790_v55  ;;  %v1641_v13 = vrot.slane %v1633_v6, %v4790_v55  ;;  %v1648_v14 = vrot.slane %v1634_v7, %v4790_v55  ;;  %4334 = vmatprep.subr.bf16.mxu1 %v4595_v0  ;;  %v273_v5 = vld [vmem:[%s5288_s3 + $0x18] sm:$0xff]  ;;  %v274_v7 = vld [vmem:[%s5288_s3 + $0x20] sm:$0xff] }
 0x40d   : > { %v4338_v4 = vpack.c.bf16 %v271_v2, %v270_v63  ;;  %v4341_v6 = vpack.c.bf16 %v273_v5, %v272_v3  ;;  %v4344_v9 = vpack.c.bf16 %v275_v8, %v274_v7  ;;  %v2016_v8 = vsub.s32 6, %v4755_v22 }
 0x40e   : > { %v1653_v16 = vcombine.low %v1625_v11, %v1632_v12  ;;  %v3928_v17 = vcombine.high %v1625_v11, %v1632_v12  ;;  %v1669_v18 = vcombine.low %v1641_v13, %v1648_v14  ;;  %v3929_v19 = vcombine.high %v1641_v13, %v1648_v14 }
 0x410   : > { %v1660_v20 = vrot.slane %v1653_v16, %v4787_v48  ;;  %v1668_v21 = vrot.slane %v3928_v17, %v4787_v48  ;;  %v1676_v25 = vrot.slane %v1669_v18, %v4787_v48  ;;  %v1684_v26 = vrot.slane %v3929_v19, %v4787_v48 }
 0x411   : > { %v1834_v18 = vsub.s32 4, %v4755_v22  ;;  %v1839_v19 = vsub.s32 5, %v4755_v22 }
 0x412   : > { %v1686_v27 = vcombine.high %v1660_v20, %v1668_v21  ;;  %v1702_v28 = vcombine.high %v1676_v25, %v1684_v26  ;;  %v1685_v30 = vcombine.low %v1660_v20, %v1668_v21  ;;  %v1701_v31 = vcombine.low %v1676_v25, %v1684_v26 }
 0x413   : > { %v1835_v21 = vrot.slane %v4763_v24, %v1834_v18 }
 0x414   : > { %v1700_v32 = vrot.slane %v1686_v27, %v4790_v55  ;;  %v1716_v33 = vrot.slane %v1702_v28, %v4790_v55  ;;  %v1693_v35 = vrot.slane %v1685_v30, %v4790_v55  ;;  %v1709_v36 = vrot.slane %v1701_v31, %v4790_v55  ;;  %v276_v31 = vld [vmem:[%s5288_s3 + $0x30] sm:$0xff] }
 0x415   : > { %v1840_v27 = vrot.slane %v4763_v24, %v1839_v19 }
 0x416   : > { %v1719_v38 = vcombine.low %v1700_v32, %v1716_v33  ;;  %v1718_v39 = vcombine.high %v1693_v35, %v1709_v36  ;;  %v1720_v40 = vcombine.high %v1700_v32, %v1716_v33  ;;  %v1717_v41 = vcombine.low %v1693_v35, %v1709_v36  ;;  %v277_v32 = vld [vmem:[%s5288_s3 + $0x38] sm:$0xff]  ;;  %v279_v35 = vld [vmem:[%s5289_s4 + $0x8] sm:$0x3] }
 0x417   : > { %v4347_v33 = vpack.c.bf16 %v277_v32, %v276_v31  ;;  %v1845_v36 = vrot.slane %v279_v35, %v4758_v23 }
 0x418   : > { %1726 = vrot.lane.b32.xlu1 %v1719_v38, %s4603_s18  ;;  %1722 = vrot.lane.b32.xlu0 %v1718_v39, %s4604_s19 }
 0x41c   : > { %1730 = vrot.lane.b32.xlu1 %v1720_v40, %s4605_s20 }
 0x48a   : > { %v1727_v42 = vpop.permute.xlu1 %1726  ;;  %v1723_v43 = vpop.permute.xlu0 %1722 }
 0x48b   : > { %v1733_v44 = vsel %vm944_vm2, %v1717_v41, %v1723_v43 }
 0x48c   : > { %v1735_v46 = vsel %vm1734_vm3, %v1733_v44, %v1727_v42  ;;  %v1923_v42 = vrot.slane %v279_v35, %v4768_v29 }
 0x48e   : > { %v1731_v45 = vpop.permute.xlu1 %1730 }
 0x48f   : > { %v1737_v47 = vsel %vm1736_vm4, %v1735_v46, %v1731_v45 }
 0x490   : > { %4161 = vmatmul.mubr.msk.f32.vlgmr.msra.gmra.mrb[8].mxu0 %vm284_vm1, %v1737_v47 }
 0x491   : > { %4190 = vmatprep.mubr.msk.f32.mxu0 %vm4596_vm0, %v4597_v1  ;;  %4339 = vmatpush3.bf16.msra.mxu0 %v4338_v4 }
 0x492   : > { %4340 = vmatprep.subr.bf16.mxu0 %v4595_v0 }
 0x495   : > { %4342 = vmatpush3.bf16.msra.mxu0 %v4341_v6 }
 0x496   : > { %4343 = vmatprep.subr.bf16.mxu0 %v4595_v0 }
 0x499   : > { %4345 = vmatpush3.bf16.msra.mxu0 %v4344_v9  ;;  %v2021_v9 = vsub.s32 7, %v4755_v22 }
 0x49a   : > { %4346 = vmatprep.subr.bf16.mxu0 %v4595_v0 }
 0x49d   : > { %4348 = vmatpush3.bf16.msra.mxu0 %v4347_v33 }
 0x49e   : > { %4361 = vmatprep.subr.bf16.mxu0 %v4595_v0 }
 0x563   : > { %v1811_v51 = vpop.f32.mrb[8].mxu0 }
 0x564   : > { %v1812_v52 = vadd.f32 %v1811_v51, %v1741_v50  ;;  %v4162_v53 = vpop.f32.mrb[9].mxu0 }
 0x565   : > { %v2026_v53 = vld [vmem:[#allocation2 + $0x88] sm:$0xff] }
 0x566   : > { %v1815_v54 = vadd.f32 %v1812_v52, %v4736_v10  ;;  %v268_v10 = vld [vmem:[%s5287_s2 + $0x10] sm:$0xff]  ;;  %v2025_v52 = vld [vmem:[#allocation2 + $0x80] sm:$0xff] }
 0x567   : > { %v4335_v62 = vpack.c.bf16 %v269_v61, %v268_v10  ;;  %v4353_v10 = vpack.c.bf16 %v2028_v60, %v2027_v59  ;;  %v2038_v61 = vld [vmem:[#allocation2 + $0xd8] sm:$0xff] }
 0x568   : > { %v1816_v56 = vsel %vm284_vm1, %v1815_v54, 0.0  ;;  %v1821_v57 = vmul.f32 %v1815_v54, %v1815_v54 }
 0x569   : > { %1817 = vadd.xlane.f32.xlu0 %v1816_v56  ;;  %4336 = vmatpush3.bf16.msra.mxu1 %v4335_v62  ;;  %v2035_v56 = vld [vmem:[#allocation2 + $0xc0] sm:$0xff]  ;;  %v4365_v62 = vpack.c.bf16 %v2038_v61, %v2037_v37 }
 0x56a   : > { %v1822_v58 = vsel %vm284_vm1, %v1821_v57, 0.0  ;;  %4349 = vmatprep.subr.bf16.mxu1 %v4595_v0  ;;  %v2036_v57 = vld [vmem:[#allocation2 + $0xc8] sm:$0xff] }
 0x56b   : > { %1823 = vadd.xlane.f32.xlu1 %v1822_v58  ;;  %v4362_v58 = vpack.c.bf16 %v2036_v57, %v2035_v56 }
 0x5f6   : > { %v1818_v11 = vpop.xlane.xlu0 %1817 }
 0x5f7   : > { %v1820_v12 = vmul.f32 0.03125, %v1818_v11 }
 0x5f8   : > { %v1824_v13 = vpop.xlane.xlu1 %1823 }
 0x5f9   : > { %v1826_v14 = vmul.f32 %v1820_v12, %v1820_v12  ;;  %v1825_v15 = vmul.f32 0.03125, %v1824_v13  ;;  %v1830_v20 = vsub.f32 %v1815_v54, %v1820_v12  ;;  %v4350_v54 = vpack.c.bf16 %v2026_v53, %v2025_v52 }
 0x5fa   : > { %v2017_v12 = vrot.slane %v4763_v24, %v2016_v8 }
 0x5fb   : > { %v1827_v16 = vsub.f32 %v1825_v15, %v1826_v14  ;;  %v2022_v15 = vrot.slane %v4763_v24, %v2021_v9  ;;  %v5018_v24 = vld [vmem:[%s5289_s4 + $0x10] sm:$0xff] }
 0x5fd   : > { %v1828_v17 = vadd.f32 1e-05, %v1827_v16  ;;  %v2030_v16 = vld [vmem:[#allocation2 + $0xa0] sm:$0xff] }
 0x5ff   : > { %4470 = vrsqrt.f32 %v1828_v17  ;;  %v2031_v17 = vld [vmem:[#allocation2 + $0xa8] sm:$0xff] }
 0x609   : > { %v4471_v25 = vpop.eup %4470 }
 0x60a   : > { %v1831_v26 = vmul.f32 %v4471_v25, %v1830_v20 }
 0x60c   : > { %v1836_v28 = vmul.f32 %v1835_v21, %v1831_v26  ;;  %v4356_v21 = vpack.c.bf16 %v2031_v17, %v2030_v16  ;;  %v2032_v26 = vld [vmem:[#allocation2 + $0xb0] sm:$0xff] }
 0x60e   : > { %v1841_v30 = vadd.f32 %v1840_v27, %v1836_v28  ;;  %v2033_v27 = vld [vmem:[#allocation2 + $0xb8] sm:$0xff] }
 0x60f   : > { %v4359_v28 = vpack.c.bf16 %v2033_v27, %v2032_v26 }
 0x610   : > { %4172 = vmatmul.mubr.msk.f32.vlgmr.msra.gmra.mrb[14].mxu1 %vm284_vm1, %v1841_v30 }
 0x611   : > { %4201 = vmatprep.mubr.msk.f32.mxu1 %vm4596_vm0, %v4597_v1  ;;  %4351 = vmatpush3.bf16.msra.mxu1 %v4350_v54 }
 0x612   : > { %4352 = vmatprep.subr.bf16.mxu1 %v4595_v0 }
 0x615   : > { %4354 = vmatpush3.bf16.msra.mxu1 %v4353_v10 }
 0x616   : > { %4355 = vmatprep.subr.bf16.mxu1 %v4595_v0 }
 0x6e3   : > { %v1915_v38 = vpop.f32.mrb[14].mxu1 }
 0x6e4   : > { %v1916_v39 = vadd.f32 %v1915_v38, %v1845_v36  ;;  %v4173_v40 = vpop.f32.mrb[15].mxu1  ;;  %v2141_v38 = vrot.slane %v5018_v24, %v4768_v29 }
 0x6e6   : > { %v1919_v41 = vmax.f32 %v1916_v39, 0.0 }
 0x6e8   : > { %4191 = vmatmul.mubr.msk.f32.vlgmr.msra.gmra.mrb[10].mxu0 %vm1924_vm5, %v1919_v41 }
 0x6e9   : > { %4223 = vmatprep.mubr.msk.f32.mxu0 %vm4596_vm0, %v4597_v1  ;;  %4363 = vmatpush3.bf16.msra.mxu0 %v4362_v58 }
 0x6ea   : > { %4364 = vmatprep.subr.bf16.mxu0 %v4595_v0 }
 0x6ed   : > { %4366 = vmatpush3.bf16.msra.mxu0 %v4365_v62 }
 0x6ee   : > { %4236 = vmatprep.subr.mxu0 %v4597_v1 }
 0x7bb   : > { %v1994_v43 = vpop.f32.mrb[10].mxu0 }
 0x7bc   : > { %v1995_v44 = vadd.f32 %v1994_v43, %v1923_v42  ;;  %v4192_v45 = vpop.f32.mrb[11].mxu0  ;;  %v2215_v42 = vrot.slane %v5018_v24, %v434_v34 }
 0x7be   : > { %v1998_v46 = vadd.f32 %v1995_v44, %v1841_v30  ;;  %v2064_v30 = vrot.slane %v5018_v24, %v4758_v23 }
 0x7c0   : > { %v1999_v47 = vsel %vm284_vm1, %v1998_v46, 0.0  ;;  %v2003_v50 = vmul.f32 %v1998_v46, %v1998_v46 }
 0x7c1   : > { %2000 = vadd.xlane.f32.xlu0 %v1999_v47 }
 0x7c2   : > { %v2004_v51 = vsel %vm284_vm1, %v2003_v50, 0.0 }
 0x7c5   : > { %2005 = vadd.xlane.f32.xlu0 %v2004_v51 }
 0x84e   : > { %v2001_v63 = vpop.xlane.xlu0 %2000 }
 0x84f   : > { %v2002_v2 = vmul.f32 0.03125, %v2001_v63 }
 0x851   : > { %v2008_v4 = vmul.f32 %v2002_v2, %v2002_v2  ;;  %v2012_v11 = vsub.f32 %v1998_v46, %v2002_v2 }
 0x852   : > { %v2006_v3 = vpop.xlane.xlu0 %2005 }
 0x853   : > { %v2007_v5 = vmul.f32 0.03125, %v2006_v3 }
 0x855   : > { %v2009_v6 = vsub.f32 %v2007_v5, %v2008_v4 }
 0x857   : > { %v2010_v7 = vadd.f32 1e-05, %v2009_v6 }
 0x859   : > { %4472 = vrsqrt.f32 %v2010_v7 }
 0x863   : > { %v4473_v13 = vpop.eup %4472 }
 0x864   : > { %v2013_v14 = vmul.f32 %v4473_v13, %v2012_v11 }
 0x866   : > { %v2018_v20 = vmul.f32 %v2017_v12, %v2013_v14 }
 0x868   : > { %v4999_v25 = vadd.f32 %v2022_v15, %v2018_v20 }
 0x86a   : > { %4202 = vmatmul.mubr.msk.f32.vlgmr.msra.gmra.mrb[16].mxu1 %vm284_vm1, %v4999_v25  ;;  %4224 = vmatmul.mubr.msk.f32.vlgmr.msra.gmra.mrb[12].mxu0 %vm284_vm1, %v4999_v25 }
 0x86b   : > { %4357 = vmatpush3.bf16.msra.mxu1 %v4356_v21  ;;  %4212 = vmatprep.mubr.msk.f32.mxu1 %vm4596_vm0, %v4597_v1 }
 0x86c   : > { %4358 = vmatprep.subr.bf16.mxu1 %v4595_v0  ;;  %4238 = vmatprep.mubr.msk.f32.mxu0 %vm4596_vm0, %v4597_v1 }
 0x86f   : > { %4360 = vmatpush3.bf16.msra.mxu1 %v4359_v28 }
 0x870   : > { %4226 = vmatprep.subr.mxu1 %v4597_v1 }
 0x872   : > { %4213 = vmatmul.mubr.msk.f32.vlgmr.msra.gmra.mrb[18].mxu1 %vm284_vm1, %v4999_v25 }
 0x873   : > { %4228 = vmatprep.mubr.msk.f32.mxu1 %vm4596_vm0, %v4597_v1 }
 0x93d   : > { %v2134_v31 = vpop.f32.mrb[16].mxu1  ;;  %v2282_v32 = vpop.f32.mrb[12].mxu0 }
 0x93e   : > { %v2135_v33 = vadd.f32 %v2134_v31, %v2064_v30  ;;  %v4203_v35 = vpop.f32.mrb[17].mxu1  ;;  %v4225_v36 = vpop.f32.mrb[13].mxu0  ;;  %v5033_v43 = vadd.f32 %v2282_v32, %v2215_v42 }
 0x940   : > { %2287 = vrot.lane.b32.xlu1 %v2135_v33, %s4598_s15 }
 0x945   : > { %v2208_v39 = vpop.f32.mrb[18].mxu1 }
 0x946   : > { %v2209_v40 = vadd.f32 %v2208_v39, %v2141_v38  ;;  %v4214_v41 = vpop.f32.mrb[19].mxu1 }
 0x948   : > { %2436 = vrot.lane.b32.xlu0 %v2209_v40, %s4600_s17  ;;  %2433 = vrot.lane.b32.xlu1 %v2209_v40, %s4598_s15 }
 0x94c   : > { %2290 = vrot.lane.b32.xlu0 %v2135_v33, %s4600_s17  ;;  %2439 = vrot.lane.b32.xlu1 %v2209_v40, %s4599_s16 }
 0x950   : > { %2293 = vrot.lane.b32.xlu1 %v2135_v33, %s4599_s16 }
 0x954   : > { %2579 = vrot.lane.b32.xlu1 %v5033_v43, %s4598_s15 }
 0x9b2   : > { %v2288_v44 = vpop.permute.xlu1 %2287 }
 0x9ba   : > { %v2437_v45 = vpop.permute.xlu0 %2436  ;;  %v2434_v46 = vpop.permute.xlu1 %2433 }
 0x9bb   : > { %v2442_v47 = vcombine.low %v2209_v40, %v2437_v45  ;;  %v2443_v50 = vcombine.high %v2209_v40, %v2437_v45 }
 0x9bd   : > { %v2450_v56 = vrot.slane %v2442_v47, %v4787_v48  ;;  %v2457_v34 = vrot.slane %v2443_v50, %v4787_v48 }
 0x9be   : > { %v2440_v51 = vpop.permute.xlu1 %2439  ;;  %v2291_v52 = vpop.permute.xlu0 %2290 }
 0x9bf   : > { %v2458_v53 = vcombine.low %v2434_v46, %v2440_v51  ;;  %v2459_v54 = vcombine.high %v2434_v46, %v2440_v51  ;;  %v2296_v59 = vcombine.low %v2135_v33, %v2291_v52  ;;  %v2297_v60 = vcombine.high %v2135_v33, %v2291_v52 }
 0x9c1   : > { %v2466_v57 = vrot.slane %v2458_v53, %v4787_v48  ;;  %v2473_v58 = vrot.slane %v2459_v54, %v4787_v48  ;;  %v2304_v11 = vrot.slane %v2296_v59, %v4787_v48  ;;  %v2311_v12 = vrot.slane %v2297_v60, %v4787_v48 }
 0x9c2   : > { %v2294_v37 = vpop.permute.xlu1 %2293 }
 0x9c3   : > { %v2474_v10 = vcombine.low %v2450_v56, %v2466_v57  ;;  %v2475_v61 = vcombine.high %v2450_v56, %v2466_v57  ;;  %v2490_v62 = vcombine.low %v2457_v34, %v2473_v58  ;;  %v2491_v63 = vcombine.high %v2457_v34, %v2473_v58 }
 0x9c4   : > { %v2312_v2 = vcombine.low %v2288_v44, %v2294_v37  ;;  %v2313_v3 = vcombine.high %v2288_v44, %v2294_v37 }
 0x9c5   : > { %v2482_v4 = vrot.slane %v2474_v10, %v4790_v55  ;;  %v2489_v5 = vrot.slane %v2475_v61, %v4790_v55  ;;  %v2498_v6 = vrot.slane %v2490_v62, %v4790_v55  ;;  %v2505_v7 = vrot.slane %v2491_v63, %v4790_v55 }
 0x9c6   : > { %v2320_v13 = vrot.slane %v2312_v2, %v4787_v48  ;;  %v2327_v14 = vrot.slane %v2313_v3, %v4787_v48 }
 0x9c7   : > { %v2510_v15 = vcombine.low %v2482_v4, %v2489_v5  ;;  %v3952_v16 = vcombine.high %v2482_v4, %v2489_v5  ;;  %v2526_v17 = vcombine.low %v2498_v6, %v2505_v7  ;;  %v3953_v20 = vcombine.high %v2498_v6, %v2505_v7 }
 0x9c8   : > { %v2328_v21 = vcombine.low %v2304_v11, %v2320_v13  ;;  %v2329_v26 = vcombine.high %v2304_v11, %v2320_v13  ;;  %v2344_v27 = vcombine.low %v2311_v12, %v2327_v14  ;;  %v2345_v28 = vcombine.high %v2311_v12, %v2327_v14 }
 0x9c9   : > { %v2517_v30 = vrot.slane %v2510_v15, %v4787_v48  ;;  %v2525_v31 = vrot.slane %v3952_v16, %v4787_v48  ;;  %v2533_v32 = vrot.slane %v2526_v17, %v4787_v48  ;;  %v2541_v33 = vrot.slane %v3953_v20, %v4787_v48 }
 0x9ca   : > { %v2336_v35 = vrot.slane %v2328_v21, %v4790_v55  ;;  %v2343_v36 = vrot.slane %v2329_v26, %v4790_v55  ;;  %v2352_v38 = vrot.slane %v2344_v27, %v4790_v55  ;;  %v2359_v39 = vrot.slane %v2345_v28, %v4790_v55 }
 0x9cb   : > { %v2542_v40 = vcombine.low %v2517_v30, %v2525_v31  ;;  %v2543_v41 = vcombine.high %v2517_v30, %v2525_v31  ;;  %v2558_v42 = vcombine.low %v2533_v32, %v2541_v33  ;;  %v2559_v44 = vcombine.high %v2533_v32, %v2541_v33  ;;  %v2580_v33 = vpop.permute.xlu1 %2579 }
 0x9cc   : > { %v2364_v45 = vcombine.low %v2336_v35, %v2343_v36  ;;  %v3950_v46 = vcombine.high %v2336_v35, %v2343_v36  ;;  %v2380_v47 = vcombine.low %v2352_v38, %v2359_v39  ;;  %v3951_v50 = vcombine.high %v2352_v38, %v2359_v39 }
 0x9cd   : > { %v2550_v51 = vrot.slane %v2542_v40, %v4790_v55  ;;  %v2566_v52 = vrot.slane %v2558_v42, %v4790_v55  ;;  %v2557_v53 = vrot.slane %v2543_v41, %v4790_v55  ;;  %v2573_v54 = vrot.slane %v2559_v44, %v4790_v55 }
 0x9ce   : > { %v2371_v56 = vrot.slane %v2364_v45, %v4787_v48  ;;  %v2379_v34 = vrot.slane %v3950_v46, %v4787_v48  ;;  %v2387_v57 = vrot.slane %v2380_v47, %v4787_v48  ;;  %v2395_v58 = vrot.slane %v3951_v50, %v4787_v48 }
 0x9cf   : > { %v2574_v59 = vcombine.low %v2550_v51, %v2566_v52  ;;  %v2576_v60 = vcombine.low %v2557_v53, %v2573_v54  ;;  %v2575_v7 = vcombine.high %v2550_v51, %v2566_v52  ;;  %v2577_v12 = vcombine.high %v2557_v53, %v2573_v54 }
 0x9d0   : > { %v2396_v37 = vcombine.low %v2371_v56, %v2379_v34  ;;  %v2397_v10 = vcombine.high %v2371_v56, %v2379_v34  ;;  %v2412_v61 = vcombine.low %v2387_v57, %v2395_v58  ;;  %v2413_v62 = vcombine.high %v2387_v57, %v2395_v58 }
 0x9d1   : > { %4227 = vmatpush3.xpose.msk.msra.mxu1 %vm944_vm2, %v2574_v59  ;;  %4237 = vmatpush3.xpose.msk.msra.mxu0 %vm944_vm2, %v2576_v60 }
 0x9d2   : > { %4231 = vmatprep.subr.mxu1 %v4597_v1  ;;  %v2404_v63 = vrot.slane %v2396_v37, %v4790_v55  ;;  %v2420_v2 = vrot.slane %v2412_v61, %v4790_v55  ;;  %v2411_v3 = vrot.slane %v2397_v10, %v4790_v55  ;;  %v2427_v4 = vrot.slane %v2413_v62, %v4790_v55 }
 0x9d3   : > { %4246 = vmatprep.subr.mxu0 %v4597_v1 }
 0x9d4   : > { %v2428_v5 = vcombine.low %v2404_v63, %v2420_v2  ;;  %v2430_v6 = vcombine.low %v2411_v3, %v2427_v4  ;;  %v2429_v11 = vcombine.high %v2404_v63, %v2420_v2  ;;  %v2431_v13 = vcombine.high %v2411_v3, %v2427_v4 }
 0x9d6   : > { %4229 = vmatmul.mubr.msk.f32.vlgmr.msra.gmra.mrb[20].mxu1 %vm944_vm2, %v2428_v5  ;;  %4239 = vmatmul.mubr.msk.f32.vlgmr.msra.gmra.mrb[14].mxu0 %vm944_vm2, %v2430_v6 }
 0x9d7   : > { %4232 = vmatpush3.xpose.msk.msra.mxu1 %vm944_vm2, %v2575_v7  ;;  %4233 = vmatprep.mubr.msk.f32.mxu1 %vm4596_vm0, %v4597_v1 }
 0x9d8   : > { %4241 = vmatprep.subr.mxu1 %v4597_v1  ;;  %4248 = vmatprep.mubr.msk.f32.mxu0 %vm4596_vm0, %v4597_v1 }
 0x9da   : > { %4234 = vmatmul.mubr.msk.f32.vlgmr.msra.gmra.mrb[22].mxu1 %vm944_vm2, %v2429_v11 }
 0x9db   : > { %4242 = vmatpush3.xpose.msk.msra.mxu1 %vm944_vm2, %v2577_v12  ;;  %4243 = vmatprep.mubr.msk.f32.mxu1 %vm4596_vm0, %v4597_v1 }
 0x9dc   : > { %4251 = vmatprep.subr.mxu1 %v4597_v1 }
 0x9de   : > { %4244 = vmatmul.mubr.msk.f32.vlgmr.msra.gmra.mrb[24].mxu1 %vm944_vm2, %v2431_v13 }
 0x9df   : > { %4253 = vmatprep.mubr.msk.f32.mxu1 %vm4596_vm0, %v4597_v1 }
 0xaa9   : > { %v2796_v14 = vpop.f32.mrb[20].mxu1  ;;  %v2948_v15 = vpop.f32.mrb[14].mxu0 }
 0xaaa   : > { %v4230_v16 = vpop.f32.mrb[21].mxu1  ;;  %v4240_v17 = vpop.f32.mrb[15].mxu0  ;;  %v3028_v20 = vsel %vm944_vm2, %v2796_v14, -inf  ;;  %v3034_v27 = vsel %vm944_vm2, %v2948_v15, -inf }
 0xaab   : > { %3029 = vmax.xlane.f32.xlu0 %v3028_v20 }
 0xaad   : > { %v2872_v21 = vpop.f32.mrb[22].mxu1 }
 0xaae   : > { %v4235_v26 = vpop.f32.mrb[23].mxu1  ;;  %v3031_v28 = vsel %vm944_vm2, %v2872_v21, -inf }
 0xaaf   : > { %3035 = vmax.xlane.f32.xlu0 %v3034_v27  ;;  %3032 = vmax.xlane.f32.xlu1 %v3031_v28 }
 0xab1   : > { %v3024_v30 = vpop.f32.mrb[24].mxu1 }
 0xab2   : > { %v4245_v31 = vpop.f32.mrb[25].mxu1  ;;  %v3037_v32 = vsel %vm944_vm2, %v3024_v30, -inf }
 0xab3   : > { %3038 = vmax.xlane.f32.xlu0 %v3037_v32 }
 0xac0   : > { %2585 = vrot.lane.b32.xlu1 %v5033_v43, %s4599_s16 }
 0xac9   : > { %2582 = vrot.lane.b32.xlu0 %v5033_v43, %s4600_s17  ;;  %s3976_s17 = sshll.u32 %s4663_s25, 7  ;;  %s4606_s25 = smov [#allocation5]  }
 0xaca   : > { %s5242_s29 = scalar_lea.hbm %s5291_s6, %s3976_s17  ;;  %s4528_s11 = sshll.u32 %s4606_s25, 4  ;;  %s4529_s11 = int_to_ptr.vmem [resolvable:$false] %s4528_s11 }
 0xb38   : > { %v3030_v35 = vpop.xlane.xlu0 %3029 }
 0xb39   : > { %v3040_v36 = vsub.f32 %v2796_v14, %v3030_v35 }
 0xb3b   : > { %v3044_v38 = vmul.f32 1.442695, %v3040_v36 }
 0xb3c   : > { %v3036_v39 = vpop.xlane.xlu0 %3035  ;;  %v3033_v40 = vpop.xlane.xlu1 %3032 }
 0xb3d   : > { %4474 = vpow2.f32 %v3044_v38  ;;  %v3042_v41 = vsub.f32 %v2948_v15, %v3036_v39  ;;  %v3041_v42 = vsub.f32 %v2872_v21, %v3033_v40 }
 0xb3f   : > { %v3046_v44 = vmul.f32 1.442695, %v3041_v42  ;;  %v3048_v45 = vmul.f32 1.442695, %v3042_v41 }
 0xb40   : > { %v2586_v46 = vpop.permute.xlu1 %2585  ;;  %v3039_v47 = vpop.xlane.xlu0 %3038 }
 0xb41   : > { %v3043_v50 = vsub.f32 %v3024_v30, %v3039_v47  ;;  %4476 = vpow2.f32 %v3046_v44  ;;  %v2604_v51 = vcombine.low %v2580_v33, %v2586_v46  ;;  %v2605_v52 = vcombine.high %v2580_v33, %v2586_v46  ;;  %v2041_v46 = vld [vmem:[#allocation2 + $0xe8] sm:$0xff] }
 0xb42   : > { %4478 = vpow2.f32 %v3048_v45  ;;  %v2040_v45 = vld [vmem:[#allocation2 + $0xe0] sm:$0xff] }
 0xb43   : > { %v3050_v53 = vmul.f32 1.442695, %v3043_v50  ;;  %v2612_v58 = vrot.slane %v2604_v51, %v4787_v48  ;;  %v2619_v59 = vrot.slane %v2605_v52, %v4787_v48  ;;  %v4368_v47 = vpack.c.bf16 %v2041_v46, %v2040_v45 }
 0xb44   : > { %v2583_v54 = vpop.permute.xlu0 %2582 }
 0xb45   : > { %4480 = vpow2.f32 %v3050_v53  ;;  %v2588_v56 = vcombine.low %v5033_v43, %v2583_v54  ;;  %v2589_v34 = vcombine.high %v5033_v43, %v2583_v54 }
 0xb47   : > { %v4475_v57 = vpop.eup %4474  ;;  %v2596_v60 = vrot.slane %v2588_v56, %v4787_v48  ;;  %v2603_v37 = vrot.slane %v2589_v34, %v4787_v48 }
 0xb48   : > { %v3052_v10 = vsel %vm944_vm2, %v4475_v57, 0.0 }
 0xb49   : > { %v2620_v61 = vcombine.low %v2596_v60, %v2612_v58  ;;  %v2621_v62 = vcombine.high %v2596_v60, %v2612_v58  ;;  %v2636_v63 = vcombine.low %v2603_v37, %v2619_v59  ;;  %v2637_v2 = vcombine.high %v2603_v37, %v2619_v59  ;;  %3053 = vadd.xlane.f32.xlu1 %v3052_v10 }
 0xb4b   : > { %v2628_v3 = vrot.slane %v2620_v61, %v4790_v55  ;;  %v2635_v43 = vrot.slane %v2621_v62, %v4790_v55  ;;  %v2644_v4 = vrot.slane %v2636_v63, %v4790_v55  ;;  %v2651_v5 = vrot.slane %v2637_v2, %v4790_v55  ;;  %v4477_v6 = vpop.eup %4476 }
 0xb4c   : > { %v4479_v14 = vpop.eup %4478  ;;  %v3055_v15 = vsel %vm944_vm2, %v4477_v6, 0.0 }
 0xb4d   : > { %v2656_v7 = vcombine.low %v2628_v3, %v2635_v43  ;;  %v3954_v11 = vcombine.high %v2628_v3, %v2635_v43  ;;  %v2672_v12 = vcombine.low %v2644_v4, %v2651_v5  ;;  %v3955_v13 = vcombine.high %v2644_v4, %v2651_v5  ;;  %3056 = vadd.xlane.f32.xlu0 %v3055_v15 }
 0xb4e   : > { %v3058_v33 = vsel %vm944_vm2, %v4479_v14, 0.0 }
 0xb4f   : > { %v4481_v16 = vpop.eup %4480  ;;  %v2663_v17 = vrot.slane %v2656_v7, %v4787_v48  ;;  %v2671_v20 = vrot.slane %v3954_v11, %v4787_v48  ;;  %v2679_v21 = vrot.slane %v2672_v12, %v4787_v48  ;;  %v2687_v26 = vrot.slane %v3955_v13, %v4787_v48 }
 0xb50   : > { %v3061_v27 = vsel %vm944_vm2, %v4481_v16, 0.0 }
 0xb51   : > { %3062 = vadd.xlane.f32.xlu1 %v3061_v27  ;;  %v2688_v28 = vcombine.low %v2663_v17, %v2671_v20  ;;  %v2704_v30 = vcombine.low %v2679_v21, %v2687_v26  ;;  %v2689_v31 = vcombine.high %v2663_v17, %v2671_v20  ;;  %v2705_v32 = vcombine.high %v2679_v21, %v2687_v26  ;;  %v2042_v26 = vld [vmem:[#allocation2 + $0xf0] sm:$0xff]  ;;  %v2043_v27 = vld [vmem:[#allocation2 + $0xf8] sm:$0xff] }
 0xb52   : > { %3059 = vadd.xlane.f32.xlu0 %v3058_v33  ;;  %v4371_v33 = vpack.c.bf16 %v2043_v27, %v2042_v26 }
 0xb53   : > { %v2696_v35 = vrot.slane %v2688_v28, %v4790_v55  ;;  %v2712_v36 = vrot.slane %v2704_v30, %v4790_v55  ;;  %v2703_v38 = vrot.slane %v2689_v31, %v4790_v55  ;;  %v2719_v39 = vrot.slane %v2705_v32, %v4790_v55 }
 0xb55   : > { %v2720_v40 = vcombine.low %v2696_v35, %v2712_v36  ;;  %v2721_v41 = vcombine.high %v2696_v35, %v2712_v36  ;;  %v2722_v42 = vcombine.low %v2703_v38, %v2719_v39  ;;  %v2723_v44 = vcombine.high %v2703_v38, %v2719_v39 }
 0xb57   : > { %4247 = vmatpush3.msra.mxu0 %v2720_v40  ;;  %4252 = vmatpush3.msra.mxu1 %v2721_v41 }
 0xb58   : > { %4249 = vmatmul.mubr.msk.f32.vlgmr.msra.gmra.mrb[16].mxu0 %vm944_vm2, %v4475_v57  ;;  %4254 = vmatmul.mubr.msk.f32.vlgmr.msra.gmra.mrb[26].mxu1 %vm944_vm2, %v4477_v6 }
 0xb59   : > { %4256 = vmatprep.subr.mxu0 %v4597_v1  ;;  %4261 = vmatprep.subr.mxu1 %v4597_v1 }
 0xb5a   : > { %4257 = vmatpush3.msra.mxu0 %v2722_v42  ;;  %4262 = vmatpush3.msra.mxu1 %v2723_v44 }
 0xb5b   : > { %4258 = vmatprep.mubr.msk.f32.mxu0 %vm4596_vm0, %v4597_v1  ;;  %4263 = vmatprep.mubr.msk.f32.mxu1 %vm4596_vm0, %v4597_v1 }
 0xb5c   : > { %4259 = vmatmul.mubr.msk.f32.vlgmr.msra.gmra.mrb[18].mxu0 %vm944_vm2, %v4479_v14  ;;  %4264 = vmatmul.mubr.msk.f32.vlgmr.msra.gmra.mrb[28].mxu1 %vm944_vm2, %v4481_v16 }
 0xb5d   : > { %4367 = vmatprep.subr.bf16.mxu0 %v4595_v0  ;;  %4274 = vmatprep.mubr.msk.f32.mxu0 %vm4596_vm0, %v4597_v1 }
 0xb5e   : > { %4373 = vmatprep.subr.bf16.mxu1 %v4595_v0  ;;  %4285 = vmatprep.mubr.msk.f32.mxu1 %vm4596_vm0, %v4597_v1 }
 0xb5f   : > { %4369 = vmatpush3.bf16.msra.mxu0 %v4368_v47 }
 0xb60   : > { %4370 = vmatprep.subr.bf16.mxu0 %v4595_v0 }
 0xb63   : > { %4372 = vmatpush3.bf16.msra.mxu0 %v4371_v33 }
 0xb64   : > { %4379 = vmatprep.subr.bf16.mxu0 %v4595_v0 }
 0xbd6   : > { %v3054_v51 = vpop.xlane.xlu1 %3053 }
 0xbd7   : > { %4482 = vrcp.f32 %v3054_v51 }
 0xbda   : > { %v3057_v50 = vpop.xlane.xlu0 %3056 }
 0xbdb   : > { %4484 = vrcp.f32 %v3057_v50 }
 0xbde   : > { %v3063_v52 = vpop.xlane.xlu1 %3062 }
 0xbdf   : > { %v3060_v53 = vpop.xlane.xlu0 %3059  ;;  %4486 = vrcp.f32 %v3063_v52 }
 0xbe0   : > { %4488 = vrcp.f32 %v3060_v53 }
 0xbe1   : > { %v4483_v34 = vpop.eup %4482 }
 0xbe5   : > { %v4485_v59 = vpop.eup %4484 }
 0xbe9   : > { %v4487_v60 = vpop.eup %4486 }
 0xbea   : > { %v4489_v37 = vpop.eup %4488 }
 0xc2b   : > { %v3133_v54 = vpop.f32.mrb[16].mxu0  ;;  %v3206_v56 = vpop.f32.mrb[26].mxu1 }
 0xc2c   : > { %v4250_v57 = vpop.f32.mrb[17].mxu0  ;;  %v4255_v58 = vpop.f32.mrb[27].mxu1  ;;  %v3357_v62 = vmul.f32 %v4483_v34, %v3133_v54  ;;  %v3359_v63 = vmul.f32 %v4485_v59, %v3206_v56 }
 0xc2f   : > { %v3279_v10 = vpop.f32.mrb[18].mxu0  ;;  %v3352_v61 = vpop.f32.mrb[28].mxu1 }
 0xc30   : > { %v3361_v2 = vmul.f32 %v4489_v37, %v3279_v10  ;;  %v3363_v3 = vmul.f32 %v4487_v60, %v3352_v61  ;;  %v4260_v43 = vpop.f32.mrb[19].mxu0  ;;  %v4265_v4 = vpop.f32.mrb[29].mxu1 }
 0xc32   : > { %v3364_v5 = vcombine.low %v3357_v62, %v3361_v2  ;;  %v3365_v6 = vcombine.high %v3357_v62, %v3361_v2  ;;  %v3380_v7 = vcombine.low %v3359_v63, %v3363_v3  ;;  %v3381_v11 = vcombine.high %v3359_v63, %v3363_v3 }
 0xc34   : > { %v3372_v12 = vrot.slane %v3364_v5, %v4787_v48  ;;  %v3379_v13 = vrot.slane %v3365_v6, %v4787_v48  ;;  %v3388_v14 = vrot.slane %v3380_v7, %v4787_v48  ;;  %v3395_v15 = vrot.slane %v3381_v11, %v4787_v48  ;;  %v3936_v7 = vld [vmem:[%s5287_s2 + $0x38] sm:$0xff] }
 0xc36   : > { %v3396_v16 = vcombine.low %v3372_v12, %v3388_v14  ;;  %v3397_v17 = vcombine.high %v3372_v12, %v3388_v14  ;;  %v3412_v20 = vcombine.low %v3379_v13, %v3395_v15  ;;  %v3413_v21 = vcombine.high %v3379_v13, %v3395_v15  ;;  %v3937_v12 = vld [vmem:[%s5288_s3 + $0x40] sm:$0xff]  ;;  %v3938_v13 = vld [vmem:[%s5288_s3 + $0x48] sm:$0xff]  ;;  %v3939_v14 = vld [vmem:[%s5288_s3 + $0x50] sm:$0xff] }
 0xc37   : > { %v4380_v15 = vpack.c.bf16 %v3938_v13, %v3937_v12 }
 0xc38   : > { %v3404_v28 = vrot.slane %v3396_v16, %v4790_v55  ;;  %v3411_v30 = vrot.slane %v3397_v17, %v4790_v55  ;;  %v3420_v31 = vrot.slane %v3412_v20, %v4790_v55  ;;  %v3427_v32 = vrot.slane %v3413_v21, %v4790_v55  ;;  %v3940_v16 = vld [vmem:[%s5288_s3 + $0x58] sm:$0xff]  ;;  %v3941_v20 = vld [vmem:[%s5288_s3 + $0x60] sm:$0xff]  ;;  %v3942_v21 = vld [vmem:[%s5288_s3 + $0x68] sm:$0xff] }
 0xc39   : > { %v4383_v17 = vpack.c.bf16 %v3940_v16, %v3939_v14  ;;  %v4386_v26 = vpack.c.bf16 %v3942_v21, %v3941_v20  ;;  %v3973_v14 = vld [vmem:[%s5290_s5] ss:$0 sm:$0xff]  ;;  %v3974_v16 = vld [vmem:[%s5290_s5 + $0x1] ss:$0 sm:$0xff] }
 0xc3a   : > { %v3432_v35 = vcombine.low %v3404_v28, %v3411_v30  ;;  %v3968_v36 = vcombine.high %v3404_v28, %v3411_v30  ;;  %v3448_v38 = vcombine.low %v3420_v31, %v3427_v32  ;;  %v3969_v39 = vcombine.high %v3420_v31, %v3427_v32 }
 0xc3c   : > { %v3439_v40 = vrot.slane %v3432_v35, %v4787_v48  ;;  %v3447_v41 = vrot.slane %v3968_v36, %v4787_v48  ;;  %v3455_v42 = vrot.slane %v3448_v38, %v4787_v48  ;;  %v3463_v44 = vrot.slane %v3969_v39, %v4787_v48 }
 0xc3d   : > { %v3611_v38 = vrot.slane %v5018_v24, %v1834_v18  ;;  %v3946_v18 = vld [vmem:[%s5289_s4 + $0x18] sm:$0x3] }
 0xc3e   : > { %v3465_v45 = vcombine.high %v3439_v40, %v3447_v41  ;;  %v3481_v46 = vcombine.high %v3455_v42, %v3463_v44  ;;  %v3464_v47 = vcombine.low %v3439_v40, %v3447_v41  ;;  %v3480_v50 = vcombine.low %v3455_v42, %v3463_v44  ;;  %v3943_v44 = vld [vmem:[%s5288_s3 + $0x70] sm:$0xff] }
 0xc3f   : > { %v3616_v41 = vrot.slane %v5018_v24, %v1839_v19  ;;  %v3621_v19 = vrot.slane %v3946_v18, %v4758_v23 }
 0xc40   : > { %v3479_v51 = vrot.slane %v3465_v45, %v4790_v55  ;;  %v3495_v52 = vrot.slane %v3481_v46, %v4790_v55  ;;  %v3472_v53 = vrot.slane %v3464_v47, %v4790_v55  ;;  %v3488_v54 = vrot.slane %v3480_v50, %v4790_v55  ;;  %v3944_v45 = vld [vmem:[%s5288_s3 + $0x78] sm:$0xff] }
 0xc41   : > { %v3518_v55 = vrot.slane %v5018_v24, %v1740_v49  ;;  %v3934_v49 = vld [vmem:[%s5287_s2 + $0x28] sm:$0xff]  ;;  %v4389_v46 = vpack.c.bf16 %v3944_v45, %v3943_v44 }
 0xc42   : > { %v3498_v56 = vcombine.low %v3479_v51, %v3495_v52  ;;  %v3497_v34 = vcombine.high %v3472_v53, %v3488_v54  ;;  %v3499_v57 = vcombine.high %v3479_v51, %v3495_v52  ;;  %v3496_v58 = vcombine.low %v3472_v53, %v3488_v54 }
 0xc43   : > { %v3699_v53 = vrot.slane %v3946_v18, %v4768_v29 }
 0xc44   : > { %3505 = vrot.lane.b32.xlu1 %v3498_v56, %s4603_s18  ;;  %3501 = vrot.lane.b32.xlu0 %v3497_v34, %s4604_s19  ;;  %s244_s18 = scalar_lea.vmem [#allocation5], %s3906_s13  ;;  %s4530_s13 = scalar_lea.vmem %s4529_s11, 256 }
 0xc45   : > { %s3841_s19 = sshll.u32 %s244_s18, 4  ;;  %s5244_s19 = int_to_ptr.vmem [resolvable:$true] %s3841_s19 }
 0xc46   : > { %s4524_s9 = scalar_lea.vmem %s5244_s19, 128  ;;  %p4531_p12 = scmp.lt.s32.totalorder %s5244_s19, %s4529_s11 }
 0xc47   : > { %p4525_p5 = scmp.ne.s32.totalorder %s5244_s19, %s4524_s9  ;;  %p4532_p2 = scmp.lt.s32.totalorder %s4530_s13, %s4524_s9 }
 0xc48   : > { %3509 = vrot.lane.b32.xlu1 %v3499_v57, %s4605_s20 }
 0xc49   : > { %p4526_p9 = pnand %p4525_p5, %p5302_p6  ;;  %p4533_p3 = por %p4532_p2, %p4531_p12 }
 0xc4b   : > { %p4527_p10 = pneg %p4526_p9 }
 0xc4d   : > { %p4534_p4 = pnand %p4533_p3, %p4527_p10 }
 0xcb6   : > { %v3506_v48 = vpop.permute.xlu1 %3505  ;;  %v3502_v59 = vpop.permute.xlu0 %3501 }
 0xcb7   : > { %v3512_v60 = vsel %vm944_vm2, %v3496_v58, %v3502_v59 }
 0xcb8   : > { %v3513_v10 = vsel %vm1734_vm3, %v3512_v60, %v3506_v48 }
 0xcba   : > { %v3510_v37 = vpop.permute.xlu1 %3509 }
 0xcbb   : > { %v3514_v61 = vsel %vm1736_vm4, %v3513_v10, %v3510_v37 }
 0xcbc   : > { %4275 = vmatmul.mubr.msk.f32.vlgmr.msra.gmra.mrb[20].mxu0 %vm284_vm1, %v3514_v61 }
 0xcbd   : > { %4304 = vmatprep.mubr.msk.f32.mxu0 %vm4596_vm0, %v4597_v1  ;;  %v3933_v1 = vld [vmem:[%s5287_s2 + $0x20] sm:$0xff]  ;;  %4381 = vmatpush3.bf16.msra.mxu0 %v4380_v15 }
 0xcbe   : > { %v4374_v6 = vpack.c.bf16 %v3934_v49, %v3933_v1  ;;  %4382 = vmatprep.subr.bf16.mxu0 %v4595_v0 }
 0xcc0   : > { %4375 = vmatpush3.bf16.msra.mxu1 %v4374_v6 }
 0xcc1   : > { %4376 = vmatprep.subr.bf16.mxu1 %v4595_v0  ;;  %4384 = vmatpush3.bf16.msra.mxu0 %v4383_v17 }
 0xcc2   : > { %4385 = vmatprep.subr.bf16.mxu0 %v4595_v0 }
 0xcc5   : > { %4387 = vmatpush3.bf16.msra.mxu0 %v4386_v26 }
 0xcc6   : > { %4388 = vmatprep.subr.bf16.mxu0 %v4595_v0 }
 0xcc9   : > { %4390 = vmatpush3.bf16.msra.mxu0 %v4389_v46 }
 0xd8f   : > { %v3588_v62 = vpop.f32.mrb[20].mxu0 }
 0xd90   : > { %v3589_v63 = vadd.f32 %v3588_v62, %v3518_v55  ;;  %v4276_v2 = vpop.f32.mrb[21].mxu0 }
 0xd92   : > { %v3592_v3 = vadd.f32 %v3589_v63, %v4999_v25  ;;  %v3935_v25 = vld [vmem:[%s5287_s2 + $0x30] sm:$0xff]  ;;  %v3792_v63 = vrot.slane %v5018_v24, %v2016_v8 }
 0xd93   : > { %v4377_v11 = vpack.c.bf16 %v3936_v7, %v3935_v25 }
 0xd94   : > { %v3593_v43 = vsel %vm284_vm1, %v3592_v3, 0.0  ;;  %v3597_v4 = vmul.f32 %v3592_v3, %v3592_v3 }
 0xd95   : > { %3594 = vadd.xlane.f32.xlu0 %v3593_v43  ;;  %4378 = vmatpush3.bf16.msra.mxu1 %v4377_v11  ;;  %v3797_v43 = vrot.slane %v5018_v24, %v2021_v9 }
 0xd96   : > { %v3598_v5 = vsel %vm284_vm1, %v3597_v4, 0.0 }
 0xd97   : > { %3599 = vadd.xlane.f32.xlu1 %v3598_v5 }
 0xe22   : > { %v3595_v27 = vpop.xlane.xlu0 %3594 }
 0xe23   : > { %v3596_v28 = vmul.f32 0.03125, %v3595_v27 }
 0xe24   : > { %v3600_v30 = vpop.xlane.xlu1 %3599 }
 0xe25   : > { %v3602_v31 = vmul.f32 %v3596_v28, %v3596_v28  ;;  %v3601_v32 = vmul.f32 0.03125, %v3600_v30  ;;  %v3606_v36 = vsub.f32 %v3592_v3, %v3596_v28 }
 0xe27   : > { %v3603_v33 = vsub.f32 %v3601_v32, %v3602_v31 }
 0xe29   : > { %v3604_v35 = vadd.f32 1e-05, %v3603_v33 }
 0xe2b   : > { %4490 = vrsqrt.f32 %v3604_v35 }
 0xe35   : > { %v4491_v39 = vpop.eup %4490 }
 0xe36   : > { %v3607_v40 = vmul.f32 %v4491_v39, %v3606_v36 }
 0xe38   : > { %v3612_v0 = vmul.f32 %v3611_v38, %v3607_v40 }
 0xe3a   : > { %v3617_v42 = vadd.f32 %v3616_v41, %v3612_v0 }
 0xe3c   : > { %4286 = vmatmul.mubr.msk.f32.vlgmr.msra.gmra.mrb[30].mxu1 %vm284_vm1, %v3617_v42 }
 0xf0f   : > { %v3691_v47 = vpop.f32.mrb[30].mxu1 }
 0xf10   : > { %v3692_v50 = vadd.f32 %v3691_v47, %v3621_v19  ;;  %v4287_v51 = vpop.f32.mrb[31].mxu1 }
 0xf12   : > { %v3695_v52 = vmax.f32 %v3692_v50, 0.0 }
 0xf14   : > { %4305 = vmatmul.mubr.msk.f32.vlgmr.msra.gmra.mrb[22].mxu0 %vm1924_vm5, %v3695_v52 }
 0xfe7   : > { %v3769_v54 = vpop.f32.mrb[22].mxu0 }
 0xfe8   : > { %v3770_v56 = vadd.f32 %v3769_v54, %v3699_v53  ;;  %v4306_v34 = vpop.f32.mrb[23].mxu0 }
 0xfea   : > { %v3773_v57 = vadd.f32 %v3770_v56, %v3617_v42 }
 0xfec   : > { %v3774_v58 = vsel %vm284_vm1, %v3773_v57, 0.0  ;;  %v3778_v48 = vmul.f32 %v3773_v57, %v3773_v57 }
 0xfed   : > { %3775 = vadd.xlane.f32.xlu0 %v3774_v58 }
 0xfee   : > { %v3779_v59 = vsel %vm284_vm1, %v3778_v48, 0.0 }
 0xff1   : > { %3780 = vadd.xlane.f32.xlu0 %v3779_v59 }
0x107a   : > { %v3776_v23 = vpop.xlane.xlu0 %3775 }
0x107b   : > { %v3777_v60 = vmul.f32 0.03125, %v3776_v23 }
0x107d   : > { %v3783_v10 = vmul.f32 %v3777_v60, %v3777_v60  ;;  %v3787_v29 = vsub.f32 %v3773_v57, %v3777_v60 }
0x107e   : > { %v3781_v37 = vpop.xlane.xlu0 %3780 }
0x107f   : > { %v3782_v61 = vmul.f32 0.03125, %v3781_v37 }
0x1081   : > { %v3784_v55 = vsub.f32 %v3782_v61, %v3783_v10 }
0x1083   : > { %v3785_v62 = vadd.f32 1e-05, %v3784_v55 }
0x1085   : > { %4492 = vrsqrt.f32 %v3785_v62 }
0x108f   : > { %v4493_v2 = vpop.eup %4492 }
0x1090   : > { %v3788_v3 = vmul.f32 %v4493_v2, %v3787_v29 }
0x1092   : > { %v3793_v4 = vmul.f32 %v3792_v63, %v3788_v3 }
0x1094   : > { %v3798_v5 = vadd.f32 %v3797_v43, %v3793_v4 }
0x1096   : > { %v3801_v1 = vsel %vm284_vm1, %v3798_v5, 0.0  ;;  %v3805_v49 = vmul.f32 %v3798_v5, %v3798_v5 }
0x1097   : > { %3802 = vadd.xlane.f32.xlu1 %v3801_v1 }
0x1098   : > { %v3806_v6 = vsel %vm284_vm1, %v3805_v49, 0.0 }
0x1099   : > { %3807 = vadd.xlane.f32.xlu0 %v3806_v6 }
0x1124   : > { %v3803_v25 = vpop.xlane.xlu1 %3802 }
0x1125   : > { %v3804_v7 = vmul.f32 0.03125, %v3803_v25 }
0x1126   : > { %v3808_v8 = vpop.xlane.xlu0 %3807 }
0x1127   : > { %v3810_v11 = vmul.f32 %v3804_v7, %v3804_v7  ;;  %v3809_v12 = vmul.f32 0.03125, %v3808_v8  ;;  %v3814_v9 = vsub.f32 %v3798_v5, %v3804_v7 }
0x1129   : > { %v3811_v13 = vsub.f32 %v3809_v12, %v3810_v11 }
0x112b   : > { %v3812_v22 = vadd.f32 1e-05, %v3811_v13 }
0x112d   : > { %4494 = vrsqrt.f32 %v3812_v22 }
0x1137   : > { %v4495_v24 = vpop.eup %4494 }
0x1138   : > { %v3815_v15 = vmul.f32 %v4495_v24, %v3814_v9 }
0x113a   : > { %v3820_v17 = vmul.f32 %v3973_v14, %v3815_v15 }
0x113c   : > { %v3825_v20 = vadd.f32 %v3974_v16, %v3820_v17 }
0x113e   : > { %3826 = vst.msk [vmem:[%s244_s18] sm:$0xff] %vm284_vm1, %v3825_v20 }
0x113f   : > { %4537 = shalt.err (!%p4534_p4)
}
0x1140   : > { %s4538_s12 = scalar_lea.hbm %s5242_s29, 128  ;;  %s4542_s15 = scalar_lea.hbm %s5291_s6, 256 }
0x1141   : > { %p4539_p7 = scmp.ne.s32.totalorder %s5242_s29, %s4538_s12  ;;  %p4543_p13 = scmp.lt.u32.totalorder %s5242_s29, %s5291_s6 }
0x1142   : > { %p4544_p1 = scmp.lt.u32.totalorder %s4542_s15, %s4538_s12  ;;  %p4546_p5 = scmp.lt.u32.totalorder %s4538_s12, %s5242_s29 }
0x1143   : > { %p4540_p8 = pnand %p4539_p7, %p5302_p6 }
0x1144   : > { %p4545_p0 = por %p4544_p1, %p4543_p13 }
0x1145   : > { %p4541_p11 = pneg %p4540_p8 }
0x1146   : > { %p4547_p9 = por %p4546_p5, %p4545_p0 }
0x1148   : > { %p4548_p10 = pnand %p4547_p9, %p4541_p11 }
0x114a   : > { %4551 = shalt.err (!%p4548_p10)
}
0x114b   : > { %4395 = dma.vmem_to_hbm [thread:$0]  (%p5302_p6), %s5244_s19, 128, %s5242_s29, %s3828_s10  }
0x114c PF: > { %p4407_p12 = scmp.ge.s32.totalorder %s4590_s24, 2  ;;  %s3853_s18 = sand.u32 1, %s4578_s21  }
0x114d   : > { %p5303_p2 = scmp.ne.s32.totalorder %s5296_s8, 0  ;;  %s3854_s20 = scalar_lea.sflag [#allocation4], %s3853_s18 }
0x114f   : > { %p4402_p3 = pnand %p4407_p12, %p5303_p2 }
0x1151   : > { %4573 = dma.done.wait (!%p4402_p3), %s3854_s20, 128  }
0x1152   : > { %4575 = vsyncadd (!%p4402_p3), %s3854_s20, 4294967168  ;;  %p17_p4 = scmp.ge.s32.totalorder %s4667_s27, 4   ;;  %s5304_s21 = smov %s4582_s22 }
0x1153   : > { %s5305_s22 = smov %s4586_s23  ;;  %s5306_s23 = smov %s4678_s30 }
0x1154   : > { %s5307_s24 = smov %s4667_s27  ;;  %19 = sbr.rel (!%p17_p4) target bundleno = 4 (0x4), region = 92 }
0x115b   :  { %3859 = vsyncpa [#allocation3], 1 }
0x115c   :  { %3861 = vsyncpa [#allocation3 + $0x1], 1 }
0x115d   :  { %3862 = vsyncpa [#allocation4], 1 }
0x115e   :  { %3864 = vsyncpa [#allocation4 + $0x1], 1 }

</bundles_post_ra>
